<compile_context>
chip_gen: v7x
topology: tpu7x:2x2x1
jax: 0.10.0
libtpu: 0.0.40
codegen_flags: <defaults>
</compile_context>

<pallas_src>
import functools

import jax
import jax.numpy as jnp
from jax.experimental import pallas as pl
from jax.experimental.pallas import tpu as pltpu


def _round_up(n, m):
    return ((n + m - 1) // m) * m


# --------------------------------------------------------------------------
# Kernel: one batch tile through the whole (padded) network.
# --------------------------------------------------------------------------
def _net_kernel(x_ref, w1_ref, b1_ref, w2_ref, b2_ref,
                w3_ref, b3_ref, w4_ref, b4_ref, out_ref):
    # Cast activations to the MXU operand dtype *inside* the kernel (no extra
    # HBM pass in the wrapper).  All accumulation / elementwise math is f32.
    x = x_ref[...].astype(w1_ref.dtype)

    # fc1 + relu   (output padded 64 -> 128 lanes; pad cols are exactly 0)
    h = jnp.dot(x, w1_ref[...], preferred_element_type=jnp.float32,
                precision=jax.lax.Precision.HIGHEST) + b1_ref[...]
    h = jnp.maximum(h, 0.0)

    # fc2 + relu   (padded input rows of w2 are 0; output padded 120 -> 128)
    h = jnp.dot(h.astype(w2_ref.dtype), w2_ref[...],
                preferred_element_type=jnp.float32,
                precision=jax.lax.Precision.HIGHEST) + b2_ref[...]
    h = jnp.maximum(h, 0.0)

    # fc3 + relu   (padded input rows of w3 are 0; output padded 64 -> 128)
    h = jnp.dot(h.astype(w3_ref.dtype), w3_ref[...],
                preferred_element_type=jnp.float32,
                precision=jax.lax.Precision.HIGHEST) + b3_ref[...]
    h = jnp.maximum(h, 0.0)

    # fc4 head (padded to 128 lanes; padded columns carry bias -1e30)
    logits = jnp.dot(h.astype(w4_ref.dtype), w4_ref[...],
                     preferred_element_type=jnp.float32,
                     precision=jax.lax.Precision.HIGHEST) + b4_ref[...]

    # log_softmax over features, numerically stable.  Padded columns:
    # exp(-1e30 - m) underflows to exactly 0, so the normalizer equals the
    # unpadded one; padded outputs are sliced off in the wrapper.
    m = jnp.max(logits, axis=1, keepdims=True)
    shifted = logits - m
    lse = jnp.log(jnp.sum(jnp.exp(shifted), axis=1, keepdims=True))
    out_ref[...] = (shifted - lse).astype(out_ref.dtype)


# --------------------------------------------------------------------------
# Wrapper
# --------------------------------------------------------------------------
@functools.partial(jax.jit,
                   static_argnames=("out_features", "block_batch", "out_dtype"))
def net_forward(x, params, out_features, *, block_batch=1024,
                out_dtype=jnp.float32):
    """x: (batch, input_size) f32.  params: output of prepare_params()."""
    w1, b1 = params["w1"], params["b1"]
    w2, b2 = params["w2"], params["b2"]
    w3, b3 = params["w3"], params["b3"]
    w4, b4 = params["w4"], params["b4"]

    batch, in_features = x.shape
    out_padded = w4.shape[1]

    # Batch tile: multiple of 16 rows (bf16 sublane pack), capped by
    # block_batch; when there is more than one minimal tile of work, cap at
    # ceil(batch/2) so the grid has >=2 steps (both TCs on v7x get work).
    tb = min(block_batch, _round_up(batch, 16))
    if batch > 16:
        tb = min(tb, _round_up(pl.cdiv(batch, 2), 16))
    grid = (pl.cdiv(batch, tb),)   # ragged last block handled by Pallas

    def resident(shape):
        # full-array block, same index every grid step -> stays VMEM-resident
        return pl.BlockSpec(shape, lambda i, _n=len(shape): (0,) * _n)

    in_specs = [
        pl.BlockSpec((tb, in_features), lambda i: (i, 0)),   # activations
        resident(w1.shape), resident(b1.shape),
        resident(w2.shape), resident(b2.shape),
        resident(w3.shape), resident(b3.shape),
        resident(w4.shape), resident(b4.shape),
    ]
    out_spec = pl.BlockSpec((tb, out_padded), lambda i: (i, 0))

    # Advisory cost estimate for XLA's scheduler.
    param_bytes = sum(int(a.size) * jnp.dtype(a.dtype).itemsize
                      for a in (w1, b1, w2, b2, w3, b3, w4, b4))
    flops = 2 * batch * (in_features * w1.shape[1]
                         + w2.shape[0] * w2.shape[1]
                         + w3.shape[0] * w3.shape[1]
                         + w4.shape[0] * w4.shape[1])
    bytes_accessed = (batch * (in_features * jnp.dtype(x.dtype).itemsize
                               + out_padded * jnp.dtype(out_dtype).itemsize)
                      + param_bytes)
    transcendentals = batch * (out_padded + 1)   # exp per lane + log per row

    out = pl.pallas_call(
        _net_kernel,
        out_shape=jax.ShapeDtypeStruct((batch, out_padded), out_dtype),
        grid=grid,
        in_specs=in_specs,
        out_specs=out_spec,
        compiler_params=pltpu.CompilerParams(
            dimension_semantics=("parallel",),
            vmem_limit_bytes=32 * 1024 * 1024),
        cost_estimate=pl.CostEstimate(flops=flops,
                                      transcendentals=transcendentals,
                                      bytes_accessed=bytes_accessed),
    )(x, w1, b1, w2, b2, w3, b3, w4, b4)

    # Only the lane slice remains (no batch padding / slicing anymore).
    return out[:, :out_features]


# --------------------------------------------------------------------------
# Parameter construction / preparation
# --------------------------------------------------------------------------
def init_params(key, input_size, output_size):
    """PyTorch nn.Linear-style init: U(-1/sqrt(fan_in), 1/sqrt(fan_in)).
    Weights stored as (in, out) == transpose of PyTorch's (out, in)."""
    sizes = [(input_size, 64), (64, 120), (120, 64), (64, output_size)]
    params = {}
    for i, (fan_in, fan_out) in enumerate(sizes, start=1):
        key, kw, kb = jax.random.split(key, 3)
        bound = 1.0 / jnp.sqrt(float(fan_in))
        params[f"w{i}"] = jax.random.uniform(
            kw, (fan_in, fan_out), jnp.float32, minval=-bound, maxval=bound)
        params[f"b{i}"] = jax.random.uniform(
            kb, (1, fan_out), jnp.float32, minval=-bound, maxval=bound)
    return params


def prepare_params(params, compute_dtype=jnp.float32):
    """One-time padding of every layer to 128-lane shapes + optional bf16 cast
    of matmul operands (biases / elementwise stay f32).

    Zero pads are exact: padded hidden columns get zero weight + zero bias so
    relu produces exactly 0, which feeds zero rows of the next weight.  The
    head's padded logit columns get bias -1e30 so exp() underflows to 0."""
    w1, b1 = params["w1"], params["b1"]   # (in, 64),  (1, 64)
    w2, b2 = params["w2"], params["b2"]   # (64, 120), (1, 120)
    w3, b3 = params["w3"], params["b3"]   # (120, 64), (1, 64)
    w4, b4 = params["w4"], params["b4"]   # (64, out), (1, out)

    h1p = _round_up(w1.shape[1], 128)     # 64  -> 128
    h2p = _round_up(w2.shape[1], 128)     # 120 -> 128
    h3p = _round_up(w3.shape[1], 128)     # 64  -> 128
    outp = _round_up(w4.shape[1], 128)    # 10  -> 128

    w1p = jnp.pad(w1, ((0, 0), (0, h1p - w1.shape[1])))
    b1p = jnp.pad(b1, ((0, 0), (0, h1p - b1.shape[1])))

    w2p = jnp.pad(w2, ((0, h1p - w2.shape[0]), (0, h2p - w2.shape[1])))
    b2p = jnp.pad(b2, ((0, 0), (0, h2p - b2.shape[1])))

    w3p = jnp.pad(w3, ((0, h2p - w3.shape[0]), (0, h3p - w3.shape[1])))
    b3p = jnp.pad(b3, ((0, 0), (0, h3p - b3.shape[1])))

    w4p = jnp.pad(w4, ((0, h3p - w4.shape[0]), (0, outp - w4.shape[1])))
    b4p = jnp.pad(b4, ((0, 0), (0, outp - b4.shape[1])),
                  constant_values=-1e30)

    return {
        "w1": w1p.astype(compute_dtype), "b1": b1p.astype(jnp.float32),
        "w2": w2p.astype(compute_dtype), "b2": b2p.astype(jnp.float32),
        "w3": w3p.astype(compute_dtype), "b3": b3p.astype(jnp.float32),
        "w4": w4p.astype(compute_dtype), "b4": b4p.astype(jnp.float32),
    }


def _reference_forward(x, params):
    hp = jax.lax.Precision.HIGHEST
    h = jnp.maximum(jnp.dot(x, params["w1"], precision=hp) + params["b1"], 0.0)
    h = jnp.maximum(jnp.dot(h, params["w2"], precision=hp) + params["b2"], 0.0)
    h = jnp.maximum(jnp.dot(h, params["w3"], precision=hp) + params["b3"], 0.0)
    logits = jnp.dot(h, params["w4"], precision=hp) + params["b4"]
    return jax.nn.log_softmax(logits, axis=1)


if __name__ == "__main__":
    input_size = 32
    output_size = 10

    key = jax.random.PRNGKey(0)
    key, kx1, kx2 = jax.random.split(key, 3)
    params = init_params(key, input_size, output_size)

    # ---- small batch, f32 compute (strict check vs reference) -------------
    x_small = jax.random.normal(kx1, (8, input_size), jnp.float32)
    p_f32 = prepare_params(params, jnp.float32)
    out_small = jax.block_until_ready(net_forward(x_small, p_f32, output_size))
    ref_small = _reference_forward(x_small, params)
    assert out_small.shape == (8, output_size)
    assert jnp.allclose(out_small, ref_small, atol=1e-4, rtol=1e-4), \
        "f32 small-batch mismatch vs JAX reference"

    # ---- ragged multi-tile grid (batch tiling, parallel axis, masked tail) -
    x_big = jax.random.normal(kx2, (200, input_size), jnp.float32)
    out_big = jax.block_until_ready(
        net_forward(x_big, p_f32, output_size, block_batch=64))
    ref_big = _reference_forward(x_big, params)
    assert out_big.shape == (200, output_size)
    assert jnp.allclose(out_big, ref_big, atol=1e-4, rtol=1e-4), \
        "f32 tiled/ragged-batch mismatch vs JAX reference"

    # ---- bf16 MXU operands + bf16 output (v6e/v7x fast path) ---------------
    p_bf16 = prepare_params(params, jnp.bfloat16)
    out_bf16 = jax.block_until_ready(
        net_forward(x_big, p_bf16, output_size, block_batch=64,
                    out_dtype=jnp.bfloat16))
    assert out_bf16.shape == (200, output_size)
    assert jnp.allclose(out_bf16.astype(jnp.float32), ref_big,
                        atol=1e-1, rtol=1e-1), \
        "bf16 path diverged from f32 reference beyond loose tolerance"

    print("KERNEL_OK")
</pallas_src>

<mosaic_0001>
module attributes {stable_mosaic.version = 11 : i64} {
  func.func @_net_kernel(%arg0: i32, %arg1: memref<16x32xf32, #tpu.memory_space<vmem>>, %arg2: memref<32x128xf32, #tpu.memory_space<vmem>>, %arg3: memref<1x128xf32, #tpu.memory_space<vmem>>, %arg4: memref<128x128xf32, #tpu.memory_space<vmem>>, %arg5: memref<1x128xf32, #tpu.memory_space<vmem>>, %arg6: memref<128x128xf32, #tpu.memory_space<vmem>>, %arg7: memref<1x128xf32, #tpu.memory_space<vmem>>, %arg8: memref<128x128xf32, #tpu.memory_space<vmem>>, %arg9: memref<1x128xf32, #tpu.memory_space<vmem>>, %arg10: memref<16x128xf32, #tpu.memory_space<vmem>>) attributes {dimension_semantics = [#tpu.dimension_semantics<parallel>], iteration_bounds = array<i64: 1>, scalar_prefetch = 0 : i64, scratch_operands = 0 : i64, tpu.core_type = #tpu.core_type<tc>, window_params = [{transform_indices = @transform_0, window_bounds = array<i64: 16, 32>}, {pipeline_mode = #tpu.pipeline_mode<synchronous>, transform_indices = @transform_1, window_bounds = array<i64: 32, 128>}, {pipeline_mode = #tpu.pipeline_mode<synchronous>, transform_indices = @transform_2, window_bounds = array<i64: 1, 128>}, {pipeline_mode = #tpu.pipeline_mode<synchronous>, transform_indices = @transform_3, window_bounds = array<i64: 128, 128>}, {pipeline_mode = #tpu.pipeline_mode<synchronous>, transform_indices = @transform_4, window_bounds = array<i64: 1, 128>}, {pipeline_mode = #tpu.pipeline_mode<synchronous>, transform_indices = @transform_5, window_bounds = array<i64: 128, 128>}, {pipeline_mode = #tpu.pipeline_mode<synchronous>, transform_indices = @transform_6, window_bounds = array<i64: 1, 128>}, {pipeline_mode = #tpu.pipeline_mode<synchronous>, transform_indices = @transform_7, window_bounds = array<i64: 128, 128>}, {pipeline_mode = #tpu.pipeline_mode<synchronous>, transform_indices = @transform_8, window_bounds = array<i64: 1, 128>}, {transform_indices = @transform_9, window_bounds = array<i64: 16, 128>}]} {
    %c0 = arith.constant 0 : index
    %c0_0 = arith.constant 0 : index
    %0 = vector.load %arg1[%c0, %c0_0] : memref<16x32xf32, #tpu.memory_space<vmem>>, vector<16x32xf32>
    %c0_1 = arith.constant 0 : index
    %c0_2 = arith.constant 0 : index
    %1 = vector.load %arg2[%c0_1, %c0_2] : memref<32x128xf32, #tpu.memory_space<vmem>>, vector<32x128xf32>
    %cst = arith.constant dense<0.000000e+00> : vector<16x128xf32>
    %2 = tpu.matmul %0, %1, %cst {dimension_numbers = #tpu.dot_dimension_numbers<[1], [0], [0], [1], [0, 0, 1, 1], [], []>, precision = #tpu.contract_precision<fp32>} : vector<16x32xf32>, vector<32x128xf32>, vector<16x128xf32> -> vector<16x128xf32>
    %c0_3 = arith.constant 0 : index
    %c0_4 = arith.constant 0 : index
    %3 = vector.load %arg3[%c0_3, %c0_4] : memref<1x128xf32, #tpu.memory_space<vmem>>, vector<1x128xf32>
    %4 = vector.broadcast %3 : vector<1x128xf32> to vector<16x128xf32>
    %5 = arith.addf %2, %4 : vector<16x128xf32>
    %cst_5 = arith.constant 0.000000e+00 : f32
    %6 = vector.broadcast %cst_5 : f32 to vector<16x128xf32>
    %7 = arith.maximumf %5, %6 : vector<16x128xf32>
    %c0_6 = arith.constant 0 : index
    %c0_7 = arith.constant 0 : index
    %8 = vector.load %arg4[%c0_6, %c0_7] : memref<128x128xf32, #tpu.memory_space<vmem>>, vector<128x128xf32>
    %cst_8 = arith.constant dense<0.000000e+00> : vector<16x128xf32>
    %9 = tpu.matmul %7, %8, %cst_8 {dimension_numbers = #tpu.dot_dimension_numbers<[1], [0], [0], [1], [0, 0, 1, 1], [], []>, precision = #tpu.contract_precision<fp32>} : vector<16x128xf32>, vector<128x128xf32>, vector<16x128xf32> -> vector<16x128xf32>
    %c0_9 = arith.constant 0 : index
    %c0_10 = arith.constant 0 : index
    %10 = vector.load %arg5[%c0_9, %c0_10] : memref<1x128xf32, #tpu.memory_space<vmem>>, vector<1x128xf32>
    %11 = vector.broadcast %10 : vector<1x128xf32> to vector<16x128xf32>
    %12 = arith.addf %9, %11 : vector<16x128xf32>
    %cst_11 = arith.constant 0.000000e+00 : f32
    %13 = vector.broadcast %cst_11 : f32 to vector<16x128xf32>
    %14 = arith.maximumf %12, %13 : vector<16x128xf32>
    %c0_12 = arith.constant 0 : index
    %c0_13 = arith.constant 0 : index
    %15 = vector.load %arg6[%c0_12, %c0_13] : memref<128x128xf32, #tpu.memory_space<vmem>>, vector<128x128xf32>
    %cst_14 = arith.constant dense<0.000000e+00> : vector<16x128xf32>
    %16 = tpu.matmul %14, %15, %cst_14 {dimension_numbers = #tpu.dot_dimension_numbers<[1], [0], [0], [1], [0, 0, 1, 1], [], []>, precision = #tpu.contract_precision<fp32>} : vector<16x128xf32>, vector<128x128xf32>, vector<16x128xf32> -> vector<16x128xf32>
    %c0_15 = arith.constant 0 : index
    %c0_16 = arith.constant 0 : index
    %17 = vector.load %arg7[%c0_15, %c0_16] : memref<1x128xf32, #tpu.memory_space<vmem>>, vector<1x128xf32>
    %18 = vector.broadcast %17 : vector<1x128xf32> to vector<16x128xf32>
    %19 = arith.addf %16, %18 : vector<16x128xf32>
    %cst_17 = arith.constant 0.000000e+00 : f32
    %20 = vector.broadcast %cst_17 : f32 to vector<16x128xf32>
    %21 = arith.maximumf %19, %20 : vector<16x128xf32>
    %c0_18 = arith.constant 0 : index
    %c0_19 = arith.constant 0 : index
    %22 = vector.load %arg8[%c0_18, %c0_19] : memref<128x128xf32, #tpu.memory_space<vmem>>, vector<128x128xf32>
    %cst_20 = arith.constant dense<0.000000e+00> : vector<16x128xf32>
    %23 = tpu.matmul %21, %22, %cst_20 {dimension_numbers = #tpu.dot_dimension_numbers<[1], [0], [0], [1], [0, 0, 1, 1], [], []>, precision = #tpu.contract_precision<fp32>} : vector<16x128xf32>, vector<128x128xf32>, vector<16x128xf32> -> vector<16x128xf32>
    %c0_21 = arith.constant 0 : index
    %c0_22 = arith.constant 0 : index
    %24 = vector.load %arg9[%c0_21, %c0_22] : memref<1x128xf32, #tpu.memory_space<vmem>>, vector<1x128xf32>
    %25 = vector.broadcast %24 : vector<1x128xf32> to vector<16x128xf32>
    %26 = arith.addf %23, %25 : vector<16x128xf32>
    %cst_23 = arith.constant dense<0xFF800000> : vector<16xf32>
    %27 = vector.multi_reduction <maximumf>, %26, %cst_23 [1] : vector<16x128xf32> to vector<16xf32>
    %28 = vector.shape_cast %27 : vector<16xf32> to vector<16x1xf32>
    %29 = vector.broadcast %28 : vector<16x1xf32> to vector<16x128xf32>
    %30 = arith.subf %26, %29 : vector<16x128xf32>
    %31 = math.exp %30 : vector<16x128xf32>
    %cst_24 = arith.constant dense<0.000000e+00> : vector<16xf32>
    %32 = vector.multi_reduction <add>, %31, %cst_24 [1] : vector<16x128xf32> to vector<16xf32>
    %33 = vector.shape_cast %32 : vector<16xf32> to vector<16x1xf32>
    %34 = math.log %33 : vector<16x1xf32>
    %35 = vector.broadcast %34 : vector<16x1xf32> to vector<16x128xf32>
    %36 = arith.subf %30, %35 : vector<16x128xf32>
    %c0_25 = arith.constant 0 : index
    %c0_26 = arith.constant 0 : index
    %37 = vector.load %arg10[%c0_25, %c0_26] : memref<16x128xf32, #tpu.memory_space<vmem>>, vector<16x128xf32>
    tpu.vector_store %arg10[%c0_25, %c0_26], %36 {strides = array<i32>} : memref<16x128xf32, #tpu.memory_space<vmem>>, vector<16x128xf32>,
    return
  }
  func.func @transform_0(%arg0: i32) -> (i32, i32) {
    %c0_i32 = arith.constant 0 : i32
    %c0_i32_0 = arith.constant 0 : i32
    return %arg0, %c0_i32 : i32, i32
  }
  func.func @transform_1(%arg0: i32) -> (i32, i32) {
    %c0_i32 = arith.constant 0 : i32
    %c0_i32_0 = arith.constant 0 : i32
    %c0_i32_1 = arith.constant 0 : i32
    return %c0_i32, %c0_i32_0 : i32, i32
  }
  func.func @transform_2(%arg0: i32) -> (i32, i32) {
    %c0_i32 = arith.constant 0 : i32
    %c0_i32_0 = arith.constant 0 : i32
    %c0_i32_1 = arith.constant 0 : i32
    return %c0_i32, %c0_i32_0 : i32, i32
  }
  func.func @transform_3(%arg0: i32) -> (i32, i32) {
    %c0_i32 = arith.constant 0 : i32
    %c0_i32_0 = arith.constant 0 : i32
    %c0_i32_1 = arith.constant 0 : i32
    return %c0_i32, %c0_i32_0 : i32, i32
  }
  func.func @transform_4(%arg0: i32) -> (i32, i32) {
    %c0_i32 = arith.constant 0 : i32
    %c0_i32_0 = arith.constant 0 : i32
    %c0_i32_1 = arith.constant 0 : i32
    return %c0_i32, %c0_i32_0 : i32, i32
  }
  func.func @transform_5(%arg0: i32) -> (i32, i32) {
    %c0_i32 = arith.constant 0 : i32
    %c0_i32_0 = arith.constant 0 : i32
    %c0_i32_1 = arith.constant 0 : i32
    return %c0_i32, %c0_i32_0 : i32, i32
  }
  func.func @transform_6(%arg0: i32) -> (i32, i32) {
    %c0_i32 = arith.constant 0 : i32
    %c0_i32_0 = arith.constant 0 : i32
    %c0_i32_1 = arith.constant 0 : i32
    return %c0_i32, %c0_i32_0 : i32, i32
  }
  func.func @transform_7(%arg0: i32) -> (i32, i32) {
    %c0_i32 = arith.constant 0 : i32
    %c0_i32_0 = arith.constant 0 : i32
    %c0_i32_1 = arith.constant 0 : i32
    return %c0_i32, %c0_i32_0 : i32, i32
  }
  func.func @transform_8(%arg0: i32) -> (i32, i32) {
    %c0_i32 = arith.constant 0 : i32
    %c0_i32_0 = arith.constant 0 : i32
    %c0_i32_1 = arith.constant 0 : i32
    return %c0_i32, %c0_i32_0 : i32, i32
  }
  func.func @transform_9(%arg0: i32) -> (i32, i32) {
    %c0_i32 = arith.constant 0 : i32
    %c0_i32_0 = arith.constant 0 : i32
    return %arg0, %c0_i32 : i32, i32
  }
}

</mosaic_0001>

<bundles_post_ra>
// kernel: net_forward.1
= control target key start
LH: loop header
LB: loop body
LE: loop exit
PB: predicated region body
PF: predicated region fallthrough
CT: control target
= control target key end

     0   :  { %14 = vsyncpa [#allocation3], 0  ;;  %s5886_s0 = inlined_call_operand.hbm [shape: f32[8,32], index: 0, kind: input, shape index: {}]   ;;  %s5887_s1 = inlined_call_operand.hbm [shape: f32[32,128], index: 1, kind: input, shape index: {}]   ;;  %s5888_s2 = inlined_call_operand.vmem [shape: f32[1,128], index: 2, kind: input, shape index: {}]   ;;  %s5889_s3 = inlined_call_operand.hbm [shape: f32[128,128], index: 3, kind: input, shape index: {}]   ;;  %s5890_s4 = inlined_call_operand.vmem [shape: f32[1,128], index: 4, kind: input, shape index: {}]   ;;  %s5891_s5 = inlined_call_operand.hbm [shape: f32[128,128], index: 5, kind: input, shape index: {}]   ;;  %s5892_s6 = inlined_call_operand.vmem [shape: f32[1,128], index: 6, kind: input, shape index: {}]   ;;  %s5893_s7 = inlined_call_operand.hbm [shape: f32[128,128], index: 7, kind: input, shape index: {}]   ;;  %s5894_s8 = inlined_call_operand.vmem [shape: f32[1,128], index: 8, kind: input, shape index: {}]   ;;  %s5895_s9 = inlined_call_operand.hbm [shape: f32[8,128], index: 9, kind: output, shape index: {}]  }
   0x1   :  { %15 = vsyncpa [#allocation6], 0 }
   0x2   :  { %16 = vsyncpa [#allocation9], 0 }
   0x3   :  { %17 = vsyncpa [#allocation4], 0 }
   0x4   :  { %22 = vsyncadd [#allocation3], 128  ;;  %s4705_s30 = smov [#allocation5]   ;;  %s4706_s11 = smov [#allocation8]  }
   0x5   :  { %s35_s10 = sshll.u32 %s4705_s30, 4  ;;  %s63_s12 = sshll.u32 %s4706_s11, 4  ;;  %s36_s10 = int_to_ptr.vmem [resolvable:$true] %s35_s10  ;;  %s4763_s12 = int_to_ptr.vmem [resolvable:$true] %s63_s12 }
   0x6   :  { %s4565_s15 = scalar_lea.hbm %s5887_s1, 512 }
   0x7   :  { %p4566_p0 = scmp.ne.s32.totalorder %s5887_s1, %s4565_s15  ;;  %p4569_p1 = scmp.lt.u32.totalorder %s4565_s15, %s5887_s1 }
   0x9   :  { %p4571_p2 = pnand %p4569_p1, %p4566_p0 }
   0xb   :  { %4574 = shalt.err (!%p4571_p2)
}
   0xc   :  { %s4575_s20 = scalar_lea.vmem %s36_s10, 512  ;;  %p4580_p4 = scmp.lt.s32.totalorder %s36_s10, %s36_s10 }
   0xd   :  { %p4576_p3 = scmp.ne.s32.totalorder %s36_s10, %s4575_s20  ;;  %p4581_p5 = scmp.lt.s32.totalorder %s4575_s20, %s4575_s20 }
   0xf   :  { %p4582_p6 = por %p4581_p5, %p4580_p4 }
  0x11   :  { %p4583_p7 = pnand %p4582_p6, %p4576_p3 }
  0x13   :  { %4586 = shalt.err (!%p4583_p7)
}
  0x14   :  { %s4707_s21 = smov 128   ;;  %s4708_s22 = smov 8  }
  0x15   :  { %41 = dma.hbm_to_vmem [thread:$0]  %s5887_s1, 512, %s36_s10, [#allocation6], %s4707_s21, %s4707_s21, %s4708_s22  }
  0x16   :  { %s4587_s27 = scalar_lea.hbm %s5891_s5, 2048 }
  0x17   :  { %p4588_p8 = scmp.ne.s32.totalorder %s5891_s5, %s4587_s27  ;;  %p4591_p9 = scmp.lt.u32.totalorder %s4587_s27, %s5891_s5 }
  0x19   :  { %p4593_p10 = pnand %p4591_p9, %p4588_p8 }
  0x1b   :  { %4596 = shalt.err (!%p4593_p10)
}
  0x1c   :  { %s4597_s13 = scalar_lea.vmem %s4763_s12, 2048  ;;  %p4602_p12 = scmp.lt.s32.totalorder %s4763_s12, %s4763_s12 }
  0x1d   :  { %p4598_p11 = scmp.ne.s32.totalorder %s4763_s12, %s4597_s13  ;;  %p4603_p13 = scmp.lt.s32.totalorder %s4597_s13, %s4597_s13 }
  0x1f   :  { %p4604_p0 = por %p4603_p13, %p4602_p12 }
  0x21   :  { %p4605_p1 = pnand %p4604_p0, %p4598_p11 }
  0x23   :  { %4608 = shalt.err (!%p4605_p1)
}
  0x24   :  { %69 = dma.hbm_to_vmem [thread:$0]  %s5891_s5, 2048, %s4763_s12, [#allocation9], %s4707_s21, %s4707_s21, %s4708_s22  }
  0x25   :  { %s4709_s14 = smov [#allocation2]   ;;  %s4710_s16 = smov [#allocation7]  }
  0x26   :  { %s23_s15 = sshll.u32 %s4709_s14, 4  ;;  %s49_s17 = sshll.u32 %s4710_s16, 4  ;;  %s24_s15 = int_to_ptr.vmem [resolvable:$true] %s23_s15  ;;  %s4800_s17 = int_to_ptr.vmem [resolvable:$true] %s49_s17 }
  0x27   :  { %s4609_s20 = scalar_lea.hbm %s5886_s0, 128 }
  0x28   :  { %p4610_p2 = scmp.ne.s32.totalorder %s5886_s0, %s4609_s20  ;;  %p4613_p3 = scmp.lt.u32.totalorder %s4609_s20, %s5886_s0 }
  0x2a   :  { %p4615_p4 = pnand %p4613_p3, %p4610_p2 }
  0x2c   :  { %4618 = shalt.err (!%p4615_p4)
}
  0x2d   :  { %s4619_s5 = scalar_lea.vmem %s24_s15, 128  ;;  %s4623_s12 = scalar_lea.vmem %s24_s15, 256 }
  0x2e   :  { %p4620_p5 = scmp.ne.s32.totalorder %s24_s15, %s4619_s5  ;;  %p4624_p6 = scmp.lt.s32.totalorder %s24_s15, %s24_s15 }
  0x2f   :  { %p4625_p7 = scmp.lt.s32.totalorder %s4623_s12, %s4619_s5 }
  0x31   :  { %p4626_p8 = por %p4625_p7, %p4624_p6 }
  0x33   :  { %p4627_p9 = pnand %p4626_p8, %p4620_p5 }
  0x35   :  { %4630 = shalt.err (!%p4627_p9)
}
  0x36   :  { %29 = dma.hbm_to_vmem [thread:$0]  %s5886_s0, 128, %s24_s15, [#allocation3], %s4707_s21, %s4707_s21, %s4708_s22  }
  0x37   :  { %s4631_s11 = scalar_lea.hbm %s5889_s3, 2048 }
  0x38   :  { %p4632_p10 = scmp.ne.s32.totalorder %s5889_s3, %s4631_s11  ;;  %p4635_p11 = scmp.lt.u32.totalorder %s4631_s11, %s5889_s3 }
  0x3a   :  { %p4637_p12 = pnand %p4635_p11, %p4632_p10 }
  0x3c   :  { %4640 = shalt.err (!%p4637_p12)
}
  0x3d   :  { %s4641_s16 = scalar_lea.vmem %s4800_s17, 2048  ;;  %p4646_p0 = scmp.lt.s32.totalorder %s4800_s17, %s4800_s17 }
  0x3e   :  { %p4642_p13 = scmp.ne.s32.totalorder %s4800_s17, %s4641_s16  ;;  %p4647_p1 = scmp.lt.s32.totalorder %s4641_s16, %s4641_s16 }
  0x40   :  { %p4648_p2 = por %p4647_p1, %p4646_p0 }
  0x42   :  { %p4649_p3 = pnand %p4648_p2, %p4642_p13 }
  0x44   :  { %4652 = shalt.err (!%p4649_p3)
}
  0x45   :  { %55 = dma.hbm_to_vmem [thread:$0]  %s5889_s3, 2048, %s4800_s17, [#allocation6], %s4707_s21, %s4707_s21, %s4708_s22  }
  0x46   :  { %s4711_s18 = smov [#allocation10]   ;;  %s4653_s24 = scalar_lea.hbm %s5893_s7, 2048 }
  0x47   :  { %s77_s19 = sshll.u32 %s4711_s18, 4  ;;  %p4654_p4 = scmp.ne.s32.totalorder %s5893_s7, %s4653_s24  ;;  %s78_s19 = int_to_ptr.vmem [resolvable:$true] %s77_s19 }
  0x48   :  { %p4657_p5 = scmp.lt.u32.totalorder %s4653_s24, %s5893_s7 }
  0x4a   :  { %p4659_p6 = pnand %p4657_p5, %p4654_p4 }
  0x4c   :  { %4662 = shalt.err (!%p4659_p6)
}
  0x4d   :  { %s4663_s27 = scalar_lea.vmem %s78_s19, 2048  ;;  %p4668_p8 = scmp.lt.s32.totalorder %s78_s19, %s78_s19 }
  0x4e   :  { %p4664_p7 = scmp.ne.s32.totalorder %s78_s19, %s4663_s27  ;;  %p4669_p9 = scmp.lt.s32.totalorder %s4663_s27, %s4663_s27 }
  0x50   :  { %p4670_p10 = por %p4669_p9, %p4668_p8 }
  0x52   :  { %p4671_p11 = pnand %p4670_p10, %p4664_p7 }
  0x54   :  { %4674 = shalt.err (!%p4671_p11)
}
  0x55   :  { %83 = dma.hbm_to_vmem [thread:$0]  %s5893_s7, 2048, %s78_s19, [#allocation9], %s4707_s21, %s4707_s21, %s4708_s22  }
  0x56   :  { %4697 = dma.done.wait [#allocation3], 256  }
  0x57   :  { %4698 = vsyncadd [#allocation3], 4294967040 }
  0x58   :  { %4699 = dma.done.wait [#allocation6], 2560  }
  0x59   :  { %4700 = vsyncadd [#allocation6], 4294964736 }
  0x5a   :  { %4701 = dma.done.wait [#allocation9], 4096  }
  0x5b   :  { %4702 = vsyncadd [#allocation9], 4294963200  ;;  %vm114_vm0 = vcmask 261120   ;;  %v103_v0 = vld [vmem:[#allocation5] sm:$0xff]  ;;  %v104_v1 = vld [vmem:[#allocation5 + $0x8] sm:$0xff] }
  0x5c   :  { %v105_v2 = vld [vmem:[#allocation5 + $0x10] sm:$0xff]  ;;  %v122_v3 = vand.u32 4294901760, %v103_v0  ;;  %v125_v4 = vand.u32 4294901760, %v104_v1  ;;  %v106_v5 = vld [vmem:[#allocation5 + $0x18] sm:$0xff]  ;;  %v4868_v20 = vld [vmem:[#allocation7] sm:$0xff] }
  0x5d   :  { %v128_v6 = vand.u32 4294901760, %v105_v2  ;;  %v101_v7 = vld [vmem:[#allocation2] sm:$0xff]  ;;  %v102_v8 = vld [vmem:[#allocation2 + $0x8] sm:$0xff]  ;;  %v131_v9 = vand.u32 4294901760, %v106_v5  ;;  %v4888_v30 = vld [vmem:[#allocation7 + $0x8] sm:$0xff]  ;;  %v675_v31 = vand.u32 4294901760, %v4868_v20 }
  0x5e   :  { %v116_v10 = vsel %vm114_vm0, %v101_v7, 0  ;;  %v119_v11 = vsel %vm114_vm0, %v102_v8, 0  ;;  %v4852_v12 = vpack.c.bf16 %v125_v4, %v122_v3  ;;  %v4858_v15 = vsub.f32 %v103_v0, %v122_v3  ;;  %v4900_v35 = vld [vmem:[#allocation7 + $0x10] sm:$0xff]  ;;  %v4908_v39 = vld [vmem:[#allocation7 + $0x18] sm:$0xff]  ;;  %v4912_v44 = vld [vmem:[#allocation7 + $0x20] sm:$0xff] }
  0x5f   :  { %v4854_v13 = vand.u32 4294901760, %v116_v10  ;;  %v4856_v14 = vand.u32 4294901760, %v119_v11  ;;  %v4860_v16 = vpack.c.bf16 %v131_v9, %v128_v6  ;;  %v4862_v17 = vsub.f32 %v104_v1, %v125_v4  ;;  %v4914_v45 = vld [vmem:[#allocation7 + $0x28] sm:$0xff]  ;;  %v4922_v50 = vld [vmem:[#allocation7 + $0x30] sm:$0xff]  ;;  %v4924_v51 = vld [vmem:[#allocation7 + $0x38] sm:$0xff] }
  0x60   :  { %v4864_v18 = vsub.f32 %v105_v2, %v128_v6  ;;  %v4866_v19 = vsub.f32 %v106_v5, %v131_v9  ;;  %3878 = vmatprep.subr.bf16.mxu0 %v4852_v12  ;;  %v213_v23 = vand.u32 4294901760, %v4858_v15  ;;  %v678_v43 = vand.u32 4294901760, %v4888_v30  ;;  %v4943_v62 = vld [vmem:[#allocation7 + $0x40] sm:$0xff]  ;;  %v4951_v0 = vld [vmem:[#allocation7 + $0x48] sm:$0xff] }
  0x61   :  { %v4872_v21 = vsub.f32 %v116_v10, %v4854_v13  ;;  %v4875_v22 = vsub.f32 %v119_v11, %v4856_v14  ;;  %3880 = vmatpush3.bf16.msra.mxu0 %v4852_v12  ;;  %v220_v24 = vand.u32 4294901760, %v4862_v17  ;;  %v4919_v48 = vsub.f32 %v4868_v20, %v675_v31  ;;  %v4981_v10 = vld [vmem:[#allocation7 + $0x50] sm:$0xff]  ;;  %v662_v11 = vld [vmem:[#allocation7 + $0x58] sm:$0xff] }
  0x62   :  { %v227_v25 = vand.u32 4294901760, %v4864_v18  ;;  %v234_v26 = vand.u32 4294901760, %v4866_v19  ;;  %3882 = vmatprep.subr.bf16.mxu0 %v4860_v16  ;;  %v214_v29 = vsub.f32 %v4858_v15, %v213_v23  ;;  %v681_v49 = vand.u32 4294901760, %v4900_v35 }
  0x63   :  { %v192_v27 = vand.u32 4294901760, %v4872_v21  ;;  %v202_v28 = vand.u32 4294901760, %v4875_v22  ;;  %v221_v32 = vsub.f32 %v4862_v17, %v220_v24  ;;  %v4929_v54 = vsub.f32 %v4888_v30, %v678_v43 }
  0x64   :  { %v228_v33 = vsub.f32 %v4864_v18, %v227_v25  ;;  %v235_v34 = vsub.f32 %v4866_v19, %v234_v26  ;;  %v215_v38 = vand.u32 4294901760, %v214_v29  ;;  %v684_v55 = vand.u32 4294901760, %v4908_v39 }
  0x65   :  { %v193_v36 = vsub.f32 %v4872_v21, %v192_v27  ;;  %v203_v37 = vsub.f32 %v4875_v22, %v202_v28  ;;  %3884 = vmatpush3.bf16.msra.mxu0 %v4860_v16  ;;  %v222_v40 = vand.u32 4294901760, %v221_v32  ;;  %v4935_v56 = vsub.f32 %v4900_v35, %v681_v49 }
  0x66   :  { %v229_v41 = vand.u32 4294901760, %v228_v33  ;;  %v236_v42 = vand.u32 4294901760, %v235_v34  ;;  %v687_v57 = vand.u32 4294901760, %v4912_v44  ;;  %v690_v58 = vand.u32 4294901760, %v4914_v45 }
  0x67   :  { %v194_v46 = vand.u32 4294901760, %v193_v36  ;;  %v204_v47 = vand.u32 4294901760, %v203_v37  ;;  %v3885_v52 = vpack.c.bf16 %v222_v40, %v215_v38  ;;  %v3989_v59 = vpack.c.bf16 %v4929_v54, %v4919_v48 }
  0x68   :  { %v3889_v53 = vpack.c.bf16 %v236_v42, %v229_v41  ;;  %v693_v60 = vand.u32 4294901760, %v4922_v50  ;;  %v696_v61 = vand.u32 4294901760, %v4924_v51  ;;  %v4949_v63 = vsub.f32 %v4908_v39, %v684_v55 }
  0x69   :  { %3189 = vmatprep.mubr.f32.mxu0 %v194_v46  ;;  %3886 = vmatprep.subr.bf16.mxu0 %v3885_v52  ;;  %v3893_v1 = vpack.c.bf16 %v4862_v17, %v4858_v15  ;;  %v4958_v2 = vsub.f32 %v4912_v44, %v687_v57  ;;  %v4963_v3 = vsub.f32 %v4914_v45, %v690_v58  ;;  %v699_v5 = vand.u32 4294901760, %v4943_v62 }
  0x6a   :  { %3190 = vmatmul.mubr.f32.vlgmr.msra.gmra.mrb[0].mxu0 %v204_v47  ;;  %3990 = vmatprep.subr.bf16.mxu1 %v3989_v59  ;;  %v3993_v4 = vpack.c.bf16 %v4949_v63, %v4935_v56  ;;  %v4973_v7 = vsub.f32 %v4922_v50, %v693_v60  ;;  %v4978_v8 = vsub.f32 %v4924_v51, %v696_v61  ;;  %v702_v9 = vand.u32 4294901760, %v4951_v0 }
  0x6b   :  { %3888 = vmatpush3.bf16.msra.mxu0 %v3885_v52  ;;  %3200 = vmatprep.mubr.f32.mxu0 %v4854_v13  ;;  %v3997_v6 = vpack.c.bf16 %v4963_v3, %v4958_v2  ;;  %v3897_v29 = vpack.c.bf16 %v4866_v19, %v4864_v18  ;;  %v705_v32 = vand.u32 4294901760, %v4981_v10  ;;  %v4992_v34 = vsub.f32 %v4943_v62, %v699_v5  ;;  %v663_v18 = vld [vmem:[#allocation7 + $0x60] sm:$0xff]  ;;  %v664_v19 = vld [vmem:[#allocation7 + $0x68] sm:$0xff] }
  0x6c   :  { %3890 = vmatprep.subr.bf16.mxu0 %v3889_v53  ;;  %3992 = vmatpush3.bf16.msra.mxu1 %v3989_v59  ;;  %v4001_v33 = vpack.c.bf16 %v4978_v8, %v4973_v7  ;;  %v4995_v36 = vsub.f32 %v4951_v0, %v702_v9  ;;  %v708_v37 = vand.u32 4294901760, %v662_v11  ;;  %v3909_v46 = vpack.c.bf16 %v220_v24, %v213_v23  ;;  %v665_v24 = vld [vmem:[#allocation7 + $0x70] sm:$0xff] }
  0x6d   :  { %3994 = vmatprep.subr.bf16.mxu1 %v3993_v4  ;;  %v5001_v40 = vsub.f32 %v4981_v10, %v705_v32  ;;  %v3913_v47 = vpack.c.bf16 %v234_v26, %v227_v25  ;;  %v5034_v15 = vpack.c.bf16 %v678_v43, %v675_v31  ;;  %v5041_v17 = vpack.c.bf16 %v684_v55, %v681_v49  ;;  %v666_v25 = vld [vmem:[#allocation7 + $0x78] sm:$0xff] }
  0x6e   :  { %v4005_v38 = vpack.c.bf16 %v4995_v36, %v4992_v34  ;;  %v5003_v41 = vsub.f32 %v662_v11, %v708_v37  ;;  %v711_v20 = vand.u32 4294901760, %v663_v18  ;;  %v778_v43 = vand.u32 4294901760, %v4919_v48 }
  0x6f   :  { %3892 = vmatpush3.bf16.msra.mxu0 %v3889_v53  ;;  %v785_v44 = vand.u32 4294901760, %v4929_v54 }
  0x70   :  { %3894 = vmatprep.subr.bf16.mxu0 %v3893_v1  ;;  %3996 = vmatpush3.bf16.msra.mxu1 %v3993_v4  ;;  %v4009_v42 = vpack.c.bf16 %v5003_v41, %v5001_v40  ;;  %v779_v49 = vsub.f32 %v4919_v48, %v778_v43 }
  0x71   :  { %3998 = vmatprep.subr.bf16.mxu1 %v3997_v6  ;;  %v786_v50 = vsub.f32 %v4929_v54, %v785_v44  ;;  %v5092_v4 = vpack.c.bf16 %v785_v44, %v778_v43  ;;  %v827_v43 = vand.u32 4294901760, %v4978_v8 }
  0x72   :  { %3201 = vmatmul.mubr.f32.vlgmr.msra.gmra.mrb[0].mxu0 %v4856_v14  ;;  %v780_v51 = vand.u32 4294901760, %v779_v49 }
  0x73   :  { %3896 = vmatpush3.bf16.msra.mxu0 %v3893_v1  ;;  %3211 = vmatprep.mubr.f32.mxu0 %v4872_v21  ;;  %v714_v21 = vand.u32 4294901760, %v664_v19  ;;  %v787_v52 = vand.u32 4294901760, %v786_v50 }
  0x74   :  { %3898 = vmatprep.subr.bf16.mxu0 %v3897_v29  ;;  %4000 = vmatpush3.bf16.msra.mxu1 %v3997_v6 }
  0x75   :  { %4002 = vmatprep.subr.bf16.mxu1 %v4001_v33  ;;  %v868_v23 = vsub.f32 %v664_v19, %v714_v21  ;;  %v5074_v39 = vpack.c.bf16 %v714_v21, %v711_v20  ;;  %v5087_v53 = vpack.c.bf16 %v787_v52, %v780_v51 }
  0x77   :  { %3900 = vmatpush3.bf16.msra.mxu0 %v3897_v29  ;;  %v2817_v29 = vld [vmem:[%s5888_s2] ss:$0 sm:$0xff] }
  0x78   :  { %3902 = vmatprep.subr.bf16.mxu0 %v4852_v12  ;;  %4004 = vmatpush3.bf16.msra.mxu1 %v4001_v33 }
  0x79   :  { %4006 = vmatprep.subr.bf16.mxu1 %v4005_v38 }
  0x7a   :  { %3212 = vmatmul.mubr.f32.vlgmr.msra.gmra.mrb[0].mxu0 %v4875_v22  ;;  %v861_v22 = vsub.f32 %v663_v18, %v711_v20  ;;  %v806_v20 = vand.u32 4294901760, %v4958_v2 }
  0x7b   :  { %3904 = vmatpush3.bf16.msra.mxu0 %v4852_v12  ;;  %3222 = vmatprep.mubr.f32.mxu0 %v192_v27  ;;  %v717_v27 = vand.u32 4294901760, %v665_v24 }
  0x7c   :  { %3906 = vmatprep.subr.bf16.mxu0 %v4860_v16  ;;  %4008 = vmatpush3.bf16.msra.mxu1 %v4005_v38  ;;  %v4013_v26 = vpack.c.bf16 %v868_v23, %v861_v22  ;;  %v862_v55 = vand.u32 4294901760, %v861_v22 }
  0x7d   :  { %4010 = vmatprep.subr.bf16.mxu1 %v4009_v42  ;;  %v875_v30 = vsub.f32 %v665_v24, %v717_v27 }
  0x7f   :  { %3908 = vmatpush3.bf16.msra.mxu0 %v4860_v16  ;;  %v876_v62 = vand.u32 4294901760, %v875_v30 }
  0x80   :  { %3910 = vmatprep.subr.bf16.mxu0 %v3909_v46  ;;  %4012 = vmatpush3.bf16.msra.mxu1 %v4009_v42 }
  0x81   :  { %4014 = vmatprep.subr.bf16.mxu1 %v4013_v26  ;;  %v877_v54 = vsub.f32 %v875_v30, %v876_v62 }
  0x82   :  { %3223 = vmatmul.mubr.f32.vlgmr.msra.gmra.mrb[0].mxu0 %v202_v28  ;;  %v720_v28 = vand.u32 4294901760, %v666_v25 }
  0x83   :  { %3912 = vmatpush3.bf16.msra.mxu0 %v3909_v46  ;;  %3233 = vmatprep.mubr.f32.mxu0 %v4854_v13  ;;  %v792_v46 = vand.u32 4294901760, %v4935_v56 }
  0x84   :  { %3914 = vmatprep.subr.bf16.mxu0 %v3913_v47  ;;  %v882_v31 = vsub.f32 %v666_v25, %v720_v28  ;;  %4016 = vmatpush3.bf16.msra.mxu1 %v4013_v26  ;;  %v5081_v45 = vpack.c.bf16 %v720_v28, %v717_v27  ;;  %v807_v28 = vsub.f32 %v4958_v2, %v806_v20 }
  0x85   :  { %v793_v24 = vsub.f32 %v4935_v56, %v792_v46 }
  0x86   :  { %v4017_v35 = vpack.c.bf16 %v882_v31, %v875_v30  ;;  %v883_v48 = vand.u32 4294901760, %v882_v31  ;;  %v808_v52 = vand.u32 4294901760, %v807_v28  ;;  %v1370_v28 = vld [vmem:[#allocation8 + $0x50] sm:$0xff] }
  0x87   :  { %3916 = vmatpush3.bf16.msra.mxu0 %v3913_v47  ;;  %v799_v47 = vand.u32 4294901760, %v4949_v63  ;;  %v794_v49 = vand.u32 4294901760, %v793_v24 }
  0x88   :  { %3918 = vmatprep.subr.bf16.mxu0 %v4852_v12  ;;  %4018 = vmatprep.subr.bf16.mxu1 %v4017_v35  ;;  %v884_v1 = vsub.f32 %v882_v31, %v883_v48  ;;  %v5098_v11 = vpack.c.bf16 %v883_v48, %v876_v62  ;;  %v834_v62 = vand.u32 4294901760, %v4992_v34  ;;  %v841_v48 = vand.u32 4294901760, %v4995_v36 }
  0x89   :  { %4020 = vmatpush3.bf16.msra.mxu1 %v4017_v35  ;;  %v800_v25 = vsub.f32 %v4949_v63, %v799_v47  ;;  %v820_v35 = vand.u32 4294901760, %v4973_v7 }
  0x8a   :  { %3234 = vmatmul.mubr.f32.vlgmr.msra.gmra.mrb[0].mxu0 %v4856_v14  ;;  %4022 = vmatprep.subr.bf16.mxu1 %v5034_v15  ;;  %v885_v6 = vand.u32 4294901760, %v884_v1 }
  0x8b   :  { %3920 = vmatpush3.bf16.msra.mxu0 %v4852_v12  ;;  %3244 = vmatprep.mubr.f32.mxu0 %v4854_v13  ;;  %v5050_v12 = vpack.c.bf16 %v690_v58, %v687_v57  ;;  %v5058_v13 = vpack.c.bf16 %v696_v61, %v693_v60  ;;  %v869_v57 = vand.u32 4294901760, %v868_v23  ;;  %v863_v58 = vsub.f32 %v861_v22, %v862_v55 }
  0x8c   :  { %3922 = vmatprep.subr.bf16.mxu0 %v4860_v16  ;;  %v813_v22 = vand.u32 4294901760, %v4963_v3  ;;  %v801_v50 = vand.u32 4294901760, %v800_v25  ;;  %v4065_v63 = vpack.c.bf16 %v827_v43, %v820_v35 }
  0x8d   :  { %v870_v59 = vsub.f32 %v868_v23, %v869_v57  ;;  %v864_v60 = vand.u32 4294901760, %v863_v58  ;;  %v5096_v10 = vpack.c.bf16 %v869_v57, %v862_v55  ;;  %v821_v58 = vsub.f32 %v4973_v7, %v820_v35  ;;  %v1361_v7 = vld [vmem:[#allocation8 + $0x8] sm:$0xff] }
  0x8e   :  { %v814_v31 = vsub.f32 %v4963_v3, %v813_v22  ;;  %v4061_v56 = vpack.c.bf16 %v813_v22, %v806_v20  ;;  %v1360_v3 = vld [vmem:[#allocation8] sm:$0xff]  ;;  %v1369_v22 = vld [vmem:[#allocation8 + $0x48] sm:$0xff] }
  0x8f   :  { %3924 = vmatpush3.bf16.msra.mxu0 %v4860_v16  ;;  %v5068_v16 = vpack.c.bf16 %v708_v37, %v705_v32  ;;  %v871_v61 = vand.u32 4294901760, %v870_v59  ;;  %v828_v59 = vsub.f32 %v4978_v8, %v827_v43  ;;  %v822_v1 = vand.u32 4294901760, %v821_v58  ;;  %v1362_v8 = vld [vmem:[#allocation8 + $0x10] sm:$0xff] }
  0x90   :  { %3926 = vmatprep.subr.bf16.mxu0 %v5034_v15  ;;  %v815_v57 = vand.u32 4294901760, %v814_v31  ;;  %v1414_v31 = vand.u32 4294901760, %v1370_v28  ;;  %v1374_v58 = vld [vmem:[#allocation8 + $0x70] sm:$0xff] }
  0x91   :  { %v5090_v0 = vpack.c.bf16 %v871_v61, %v864_v60  ;;  %v3961_v61 = vpack.c.bf16 %v801_v50, %v794_v49  ;;  %v1373_v49 = vld [vmem:[#allocation8 + $0x68] sm:$0xff] }
  0x92   :  { %3245 = vmatmul.mubr.f32.vlgmr.msra.gmra.mrb[0].mxu0 %v4856_v14  ;;  %v5064_v14 = vpack.c.bf16 %v702_v9, %v699_v5  ;;  %v878_v5 = vand.u32 4294901760, %v877_v54  ;;  %v3965_v54 = vpack.c.bf16 %v815_v57, %v808_v52 }
  0x93   :  { %3928 = vmatpush3.bf16.msra.mxu0 %v5034_v15 }
  0x94   :  { %3930 = vmatprep.subr.bf16.mxu0 %v5041_v17  ;;  %v5094_v9 = vpack.c.bf16 %v885_v6, %v878_v5  ;;  %v829_v5 = vand.u32 4294901760, %v828_v59  ;;  %v835_v6 = vsub.f32 %v4992_v34, %v834_v62  ;;  %v1375_v59 = vld [vmem:[#allocation8 + $0x78] sm:$0xff] }
  0x97   :  { %3932 = vmatpush3.bf16.msra.mxu0 %v5041_v17 }
  0x98   :  { %3934 = vmatprep.subr.bf16.mxu0 %v5050_v12 }
  0x9b   :  { %3936 = vmatpush3.bf16.msra.mxu0 %v5050_v12 }
  0x9c   :  { %3938 = vmatprep.subr.bf16.mxu0 %v5058_v13 }
  0x9f   :  { %3940 = vmatpush3.bf16.msra.mxu0 %v5058_v13 }
  0xa0   :  { %3942 = vmatprep.subr.bf16.mxu0 %v5064_v14 }
  0xa3   :  { %3944 = vmatpush3.bf16.msra.mxu0 %v5064_v14 }
  0xa4   :  { %3946 = vmatprep.subr.bf16.mxu0 %v5068_v16 }
  0xa7   :  { %3948 = vmatpush3.bf16.msra.mxu0 %v5068_v16 }
  0xa8   :  { %3950 = vmatprep.subr.bf16.mxu0 %v5074_v39 }
  0xab   :  { %3952 = vmatpush3.bf16.msra.mxu0 %v5074_v39 }
  0xac   :  { %3954 = vmatprep.subr.bf16.mxu0 %v5081_v45 }
  0xaf   :  { %3956 = vmatpush3.bf16.msra.mxu0 %v5081_v45 }
  0xb0   :  { %3958 = vmatprep.subr.bf16.mxu0 %v5087_v53 }
 0x165   :  { %v3246_v32 = vpop.f32.mrb[0].mxu0 }
 0x166   :  { %v4501_v33 = vadd.f32 %v3246_v32, %v2817_v29  ;;  %v639_v37 = vpop.f32.mrb[1].mxu0  ;;  %v848_v32 = vand.u32 4294901760, %v5001_v40 }
 0x167   :  { %v4502_v38 = vadd.f32 %v2817_v29, %v639_v37  ;;  %v842_v29 = vsub.f32 %v4995_v36, %v841_v48  ;;  %v836_v37 = vand.u32 4294901760, %v835_v6 }
 0x168   :  { %v650_v42 = vmax.f32 %v4501_v33, 0.0  ;;  %v855_v33 = vand.u32 4294901760, %v5003_v41 }
 0x169   :  { %v649_v18 = vmax.f32 %v4502_v38, 0.0  ;;  %v843_v38 = vand.u32 4294901760, %v842_v29 }
 0x16a   :  { %v5105_v19 = vand.u32 4294901760, %v650_v42  ;;  %v4073_v2 = vpack.c.bf16 %v855_v33, %v848_v32 }
 0x16b   :  { %v5108_v21 = vand.u32 4294901760, %v649_v18  ;;  %v3973_v34 = vpack.c.bf16 %v843_v38, %v836_v37 }
 0x16c   :  { %v5112_v23 = vsub.f32 %v650_v42, %v5105_v19  ;;  %v849_v42 = vsub.f32 %v5001_v40, %v848_v32  ;;  %v4057_v40 = vpack.c.bf16 %v799_v47, %v792_v46 }
 0x16d   :  { %v756_v26 = vsub.f32 %v649_v18, %v5108_v21  ;;  %v856_v18 = vsub.f32 %v5003_v41, %v855_v33  ;;  %v4069_v41 = vpack.c.bf16 %v841_v48, %v834_v62 }
 0x16e   :  { %v767_v27 = vand.u32 4294901760, %v5112_v23  ;;  %v850_v36 = vand.u32 4294901760, %v849_v42 }
 0x16f   :  { %3349 = vmatprep.mubr.f32.mxu1 %v756_v26  ;;  %v757_v30 = vand.u32 4294901760, %v756_v26  ;;  %v857_v24 = vand.u32 4294901760, %v856_v18 }
 0x170   :  { %v768_v44 = vsub.f32 %v5112_v23, %v767_v27  ;;  %3350 = vmatmul.mubr.f32.vlgmr.msra.gmra.mrb[0].mxu1 %v5112_v23 }
 0x171   :  { %4024 = vmatpush3.bf16.msra.mxu1 %v5034_v15  ;;  %3384 = vmatprep.mubr.f32.mxu1 %v757_v30  ;;  %v758_v51 = vsub.f32 %v756_v26, %v757_v30  ;;  %v3977_v25 = vpack.c.bf16 %v857_v24, %v850_v36  ;;  %v1411_v26 = vand.u32 4294901760, %v1369_v22  ;;  %v1371_v30 = vld [vmem:[#allocation8 + $0x58] sm:$0xff] }
 0x172   :  { %4026 = vmatprep.subr.bf16.mxu1 %v5041_v17  ;;  %v769_v60 = vand.u32 4294901760, %v768_v44  ;;  %v1417_v35 = vand.u32 4294901760, %v1371_v30  ;;  %v1372_v44 = vld [vmem:[#allocation8 + $0x60] sm:$0xff] }
 0x173   :  { %v759_v55 = vand.u32 4294901760, %v758_v51  ;;  %v1420_v50 = vand.u32 4294901760, %v1372_v44  ;;  %v1423_v51 = vand.u32 4294901760, %v1373_v49 }
 0x174   :  { %v5250_v43 = vpack.c.bf16 %v1417_v35, %v1414_v31 }
 0x175   :  { %4028 = vmatpush3.bf16.msra.mxu1 %v5041_v17  ;;  %3279 = vmatprep.mubr.f32.mxu0 %v759_v55  ;;  %v5254_v52 = vpack.c.bf16 %v1423_v51, %v1420_v50 }
 0x176   :  { %3280 = vmatmul.mubr.f32.vlgmr.msra.gmra.mrb[2].mxu0 %v769_v60  ;;  %4030 = vmatprep.subr.bf16.mxu1 %v5050_v12  ;;  %v1426_v60 = vand.u32 4294901760, %v1374_v58 }
 0x177   :  { %3960 = vmatpush3.bf16.msra.mxu0 %v5087_v53  ;;  %3314 = vmatprep.mubr.f32.mxu0 %v5108_v21  ;;  %v3969_v53 = vpack.c.bf16 %v829_v5, %v822_v1 }
 0x178   :  { %3962 = vmatprep.subr.bf16.mxu0 %v3961_v61 }
 0x179   :  { %4032 = vmatpush3.bf16.msra.mxu1 %v5050_v12 }
 0x17a   :  { %4034 = vmatprep.subr.bf16.mxu1 %v5058_v13 }
 0x17b   :  { %3964 = vmatpush3.bf16.msra.mxu0 %v3961_v61  ;;  %v1429_v61 = vand.u32 4294901760, %v1375_v59 }
 0x17c   :  { %3966 = vmatprep.subr.bf16.mxu0 %v3965_v54 }
 0x17d   :  { %4036 = vmatpush3.bf16.msra.mxu1 %v5058_v13 }
 0x17e   :  { %4038 = vmatprep.subr.bf16.mxu1 %v5064_v14 }
 0x17f   :  { %3968 = vmatpush3.bf16.msra.mxu0 %v3965_v54  ;;  %v5264_v54 = vpack.c.bf16 %v1429_v61, %v1426_v60 }
 0x180   :  { %3970 = vmatprep.subr.bf16.mxu0 %v3969_v53 }
 0x181   :  { %4040 = vmatpush3.bf16.msra.mxu1 %v5064_v14 }
 0x182   :  { %4042 = vmatprep.subr.bf16.mxu1 %v5068_v16 }
 0x183   :  { %3972 = vmatpush3.bf16.msra.mxu0 %v3969_v53 }
 0x184   :  { %3974 = vmatprep.subr.bf16.mxu0 %v3973_v34 }
 0x185   :  { %4044 = vmatpush3.bf16.msra.mxu1 %v5068_v16 }
 0x186   :  { %4046 = vmatprep.subr.bf16.mxu1 %v5074_v39 }
 0x187   :  { %3976 = vmatpush3.bf16.msra.mxu0 %v3973_v34 }
 0x188   :  { %3978 = vmatprep.subr.bf16.mxu0 %v3977_v25 }
 0x189   :  { %4048 = vmatpush3.bf16.msra.mxu1 %v5074_v39 }
 0x18a   :  { %4050 = vmatprep.subr.bf16.mxu1 %v5081_v45 }
 0x18b   :  { %3980 = vmatpush3.bf16.msra.mxu0 %v3977_v25 }
 0x18c   :  { %3982 = vmatprep.subr.bf16.mxu0 %v5090_v0 }
 0x18d   :  { %4052 = vmatpush3.bf16.msra.mxu1 %v5081_v45 }
 0x18e   :  { %4054 = vmatprep.subr.bf16.mxu1 %v5092_v4 }
 0x18f   :  { %3984 = vmatpush3.bf16.msra.mxu0 %v5090_v0 }
 0x190   :  { %3385 = vmatmul.mubr.f32.vlgmr.msra.gmra.mrb[0].mxu1 %v767_v27  ;;  %3986 = vmatprep.subr.bf16.mxu0 %v5094_v9 }
 0x191   :  { %4056 = vmatpush3.bf16.msra.mxu1 %v5092_v4  ;;  %3419 = vmatprep.mubr.f32.mxu1 %v5108_v21 }
 0x192   :  { %4058 = vmatprep.subr.bf16.mxu1 %v4057_v40 }
 0x193   :  { %3988 = vmatpush3.bf16.msra.mxu0 %v5094_v9 }
 0x195   :  { %4060 = vmatpush3.bf16.msra.mxu1 %v4057_v40  ;;  %v5293_v40 = vsub.f32 %v1369_v22, %v1411_v26  ;;  %v5317_v22 = vsub.f32 %v1372_v44, %v1420_v50 }
 0x196   :  { %3315 = vmatmul.mubr.f32.vlgmr.msra.gmra.mrb[2].mxu0 %v5105_v19  ;;  %4062 = vmatprep.subr.bf16.mxu1 %v4061_v56 }
 0x199   :  { %4064 = vmatpush3.bf16.msra.mxu1 %v4061_v56 }
 0x19a   :  { %4066 = vmatprep.subr.bf16.mxu1 %v4065_v63 }
 0x19d   :  { %4068 = vmatpush3.bf16.msra.mxu1 %v4065_v63  ;;  %v1550_v63 = vand.u32 4294901760, %v5293_v40 }
 0x19e   :  { %4070 = vmatprep.subr.bf16.mxu1 %v4069_v41 }
 0x1a1   :  { %4072 = vmatpush3.bf16.msra.mxu1 %v4069_v41 }
 0x1a2   :  { %4074 = vmatprep.subr.bf16.mxu1 %v4073_v2 }
 0x1a5   :  { %4076 = vmatpush3.bf16.msra.mxu1 %v4073_v2  ;;  %v1551_v2 = vsub.f32 %v5293_v40, %v1550_v63 }
 0x1a6   :  { %4078 = vmatprep.subr.bf16.mxu1 %v5096_v10 }
 0x1a9   :  { %4080 = vmatpush3.bf16.msra.mxu1 %v5096_v10  ;;  %v5220_v10 = vld [vmem:[#allocation8 + $0x30] sm:$0xff] }
 0x1aa   :  { %4082 = vmatprep.subr.bf16.mxu1 %v5098_v11  ;;  %v1402_v47 = vand.u32 4294901760, %v5220_v10 }
 0x1ad   :  { %4084 = vmatpush3.bf16.msra.mxu1 %v5098_v11  ;;  %v5222_v11 = vld [vmem:[#allocation8 + $0x38] sm:$0xff] }
 0x1ae   :  { %4086 = vmatprep.subr.bf16.mxu1 %v5034_v15 }
 0x1b0   :  { %3420 = vmatmul.mubr.f32.vlgmr.msra.gmra.mrb[0].mxu1 %v5105_v19 }
 0x1b1   :  { %4088 = vmatpush3.bf16.msra.mxu1 %v5034_v15  ;;  %3454 = vmatprep.mubr.f32.mxu1 %v5108_v21  ;;  %v1384_v15 = vand.u32 4294901760, %v1360_v3  ;;  %v1368_v21 = vld [vmem:[#allocation8 + $0x40] sm:$0xff] }
 0x1b2   :  { %4090 = vmatprep.subr.bf16.mxu1 %v5041_v17  ;;  %v1408_v23 = vand.u32 4294901760, %v1368_v21 }
 0x1b3   :  { %v5256_v55 = vsub.f32 %v1360_v3, %v1384_v15  ;;  %v5303_v3 = vsub.f32 %v1370_v28, %v1414_v31 }
 0x1b4   :  { %v5246_v27 = vpack.c.bf16 %v1411_v26, %v1408_v23  ;;  %v5291_v25 = vsub.f32 %v1368_v21, %v1408_v23  ;;  %v5319_v23 = vsub.f32 %v1373_v49, %v1423_v51 }
 0x1b5   :  { %4092 = vmatpush3.bf16.msra.mxu1 %v5041_v17  ;;  %v1387_v17 = vand.u32 4294901760, %v1361_v7  ;;  %v1487_v62 = vand.u32 4294901760, %v5256_v55 }
 0x1b6   :  { %4094 = vmatprep.subr.bf16.mxu1 %v5050_v12  ;;  %v1543_v56 = vand.u32 4294901760, %v5291_v25  ;;  %v5898_v31 = vand.u32 4294901760, %v5319_v23 }
 0x1b7   :  { %v5214_v4 = vpack.c.bf16 %v1387_v17, %v1384_v15  ;;  %v5258_v57 = vsub.f32 %v1361_v7, %v1387_v17  ;;  %v1488_v1 = vsub.f32 %v5256_v55, %v1487_v62  ;;  %v5305_v7 = vsub.f32 %v1371_v30, %v1417_v35 }
 0x1b8   :  { %v1544_v41 = vsub.f32 %v5291_v25, %v1543_v56  ;;  %v1552_v15 = vand.u32 4294901760, %v1551_v2  ;;  %v1557_v17 = vand.u32 4294901760, %v5303_v3  ;;  %v5899_v30 = vand.u32 4294901760, %v5317_v22 }
 0x1b9   :  { %4096 = vmatpush3.bf16.msra.mxu1 %v5050_v12  ;;  %v1363_v12 = vld [vmem:[#allocation8 + $0x18] sm:$0xff]  ;;  %4118 = vmatprep.subr.bf16.mxu0 %v5214_v4  ;;  %v1494_v48 = vand.u32 4294901760, %v5258_v57  ;;  %v1489_v32 = vand.u32 4294901760, %v1488_v1  ;;  %v1579_v44 = vsub.f32 %v5319_v23, %v5898_v31  ;;  %v5359_v2 = vpack.c.bf16 %v5305_v7, %v5303_v3 }
 0x1ba   :  { %4098 = vmatprep.subr.bf16.mxu1 %v5058_v13  ;;  %v1393_v0 = vand.u32 4294901760, %v1363_v12  ;;  %4120 = vmatpush3.bf16.msra.mxu0 %v5214_v4  ;;  %v1572_v1 = vsub.f32 %v5317_v22, %v5899_v30 }
 0x1bb   :  { %v1495_v5 = vsub.f32 %v5258_v57, %v1494_v48 }
 0x1bc   :  { %v5274_v29 = vsub.f32 %v1363_v12, %v1393_v0  ;;  %v1564_v12 = vand.u32 4294901760, %v5305_v7  ;;  %v1573_v49 = vand.u32 4294901760, %v1572_v1 }
 0x1bd   :  { %4100 = vmatpush3.bf16.msra.mxu1 %v5058_v13  ;;  %v1390_v13 = vand.u32 4294901760, %v1362_v8  ;;  %v1496_v33 = vand.u32 4294901760, %v1495_v5  ;;  %v5328_v5 = vsub.f32 %v1374_v58, %v1426_v60 }
 0x1be   :  { %4102 = vmatprep.subr.bf16.mxu1 %v5064_v14  ;;  %v1508_v37 = vand.u32 4294901760, %v5274_v29  ;;  %v1565_v21 = vsub.f32 %v5305_v7, %v1564_v12  ;;  %v2081_v7 = vld [vmem:[#allocation10 + $0x60] sm:$0xff] }
 0x1bf   :  { %v5218_v9 = vpack.c.bf16 %v1393_v0, %v1390_v13  ;;  %v5272_v6 = vsub.f32 %v1362_v8, %v1390_v13  ;;  %v5280_v38 = vpack.c.bf16 %v1496_v33, %v1489_v32  ;;  %v1545_v8 = vand.u32 4294901760, %v1544_v41 }
 0x1c0   :  { %v1509_v18 = vsub.f32 %v5274_v29, %v1508_v37  ;;  %v1558_v0 = vsub.f32 %v5303_v3, %v1557_v17  ;;  %v1566_v28 = vand.u32 4294901760, %v1565_v21  ;;  %v5330_v32 = vsub.f32 %v1375_v59, %v1429_v61 }
 0x1c1   :  { %4104 = vmatpush3.bf16.msra.mxu1 %v5064_v14  ;;  %v5210_v14 = vld [vmem:[#allocation8 + $0x20] sm:$0xff]  ;;  %4122 = vmatprep.subr.bf16.mxu0 %v5218_v9  ;;  %v1501_v53 = vand.u32 4294901760, %v5272_v6  ;;  %v5309_v13 = vpack.c.bf16 %v1552_v15, %v1545_v8  ;;  %v5897_v50 = vand.u32 4294901760, %v5328_v5  ;;  %v1580_v33 = vand.u32 4294901760, %v1579_v44 }
 0x1c2   :  { %4106 = vmatprep.subr.bf16.mxu1 %v5068_v16  ;;  %4124 = vmatpush3.bf16.msra.mxu0 %v5218_v9  ;;  %v1510_v36 = vand.u32 4294901760, %v1509_v18  ;;  %v1559_v26 = vand.u32 4294901760, %v1558_v0  ;;  %v5896_v51 = vand.u32 4294901760, %v5330_v32  ;;  %v5355_v41 = vpack.c.bf16 %v5293_v40, %v5291_v25 }
 0x1c3   :  { %v1502_v42 = vsub.f32 %v5272_v6, %v1501_v53  ;;  %v5343_v59 = vpack.c.bf16 %v1580_v33, %v1573_v49  ;;  %v5363_v15 = vpack.c.bf16 %v5319_v23, %v5317_v22  ;;  %v5367_v21 = vpack.c.bf16 %v5330_v32, %v5328_v5 }
 0x1c4   :  { %v5323_v35 = vpack.c.bf16 %v1566_v28, %v1559_v26  ;;  %v1593_v58 = vsub.f32 %v5330_v32, %v5896_v51  ;;  %v2818_v26 = vld [vmem:[%s5890_s4] ss:$0 sm:$0xff]  ;;  %v5912_v25 = vand.u32 4294901760, %v5330_v32 }
 0x1c5   :  { %4108 = vmatpush3.bf16.msra.mxu1 %v5068_v16  ;;  %v5212_v16 = vld [vmem:[#allocation8 + $0x28] sm:$0xff]  ;;  %v1503_v34 = vand.u32 4294901760, %v1502_v42  ;;  %v1586_v42 = vsub.f32 %v5328_v5, %v5897_v50 }
 0x1c6   :  { %4110 = vmatprep.subr.bf16.mxu1 %v5074_v39  ;;  %v1594_v61 = vand.u32 4294901760, %v1593_v58 }
 0x1c7   :  { %v5289_v24 = vpack.c.bf16 %v1510_v36, %v1503_v34  ;;  %v1587_v60 = vand.u32 4294901760, %v1586_v42  ;;  %v5347_v34 = vpack.c.bf16 %v5258_v57, %v5256_v55  ;;  %v5351_v36 = vpack.c.bf16 %v5274_v29, %v5272_v6 }
 0x1c8   :  { %v5909_v6 = vand.u32 4294901760, %v5317_v22  ;;  %v5910_v29 = vand.u32 4294901760, %v5319_v23 }
 0x1c9   :  { %4112 = vmatpush3.bf16.msra.mxu1 %v5074_v39  ;;  %v1396_v39 = vand.u32 4294901760, %v5210_v14  ;;  %v4177_v18 = vpack.c.bf16 %v1594_v61, %v1587_v60 }
 0x1ca   :  { %4114 = vmatprep.subr.bf16.mxu1 %v5081_v45 }
 0x1cb   :  { %v5375_v58 = vsub.f32 %v5210_v14, %v1396_v39  ;;  %v5394_v14 = vsub.f32 %v5220_v10, %v1402_v47 }
 0x1cd   :  { %4116 = vmatpush3.bf16.msra.mxu1 %v5081_v45  ;;  %v1399_v45 = vand.u32 4294901760, %v5212_v16 }
 0x1cf   :  { %v5231_v46 = vpack.c.bf16 %v1399_v45, %v1396_v39  ;;  %v5380_v61 = vsub.f32 %v5212_v16, %v1399_v45 }
 0x1d0   :  { %3455 = vmatmul.mubr.f32.vlgmr.msra.gmra.mrb[0].mxu1 %v5105_v19  ;;  %v1405_v19 = vand.u32 4294901760, %v5222_v11 }
 0x1d1   :  { %4126 = vmatprep.subr.bf16.mxu0 %v5231_v46 }
 0x1d2   :  { %v5241_v20 = vpack.c.bf16 %v1405_v19, %v1402_v47  ;;  %4128 = vmatpush3.bf16.msra.mxu0 %v5231_v46  ;;  %v5399_v16 = vsub.f32 %v5222_v11, %v1405_v19  ;;  %v1529_v47 = vand.u32 4294901760, %v5394_v14 }
 0x1d4   :  { %4130 = vmatprep.subr.bf16.mxu0 %v5241_v20  ;;  %v1536_v19 = vand.u32 4294901760, %v5399_v16  ;;  %v1530_v31 = vsub.f32 %v5394_v14, %v1529_v47 }
 0x1d6   :  { %4132 = vmatpush3.bf16.msra.mxu0 %v5241_v20  ;;  %v1537_v30 = vsub.f32 %v5399_v16, %v1536_v19  ;;  %v4257_v57 = vpack.c.bf16 %v1536_v19, %v1529_v47 }
 0x1d7   :  { %4134 = vmatprep.subr.bf16.mxu0 %v5246_v27 }
 0x1da   :  { %4136 = vmatpush3.bf16.msra.mxu0 %v5246_v27 }
 0x1db   :  { %4138 = vmatprep.subr.bf16.mxu0 %v5250_v43 }
 0x1de   :  { %4140 = vmatpush3.bf16.msra.mxu0 %v5250_v43 }
 0x1df   :  { %4142 = vmatprep.subr.bf16.mxu0 %v5254_v52 }
 0x1e2   :  { %4144 = vmatpush3.bf16.msra.mxu0 %v5254_v52 }
 0x1e3   :  { %4146 = vmatprep.subr.bf16.mxu0 %v5264_v54 }
 0x1e6   :  { %4148 = vmatpush3.bf16.msra.mxu0 %v5264_v54 }
 0x1e7   :  { %4150 = vmatprep.subr.bf16.mxu0 %v5280_v38 }
 0x269   :  { %v3316_v8 = vpop.f32.mrb[2].mxu0 }
 0x26a   :  { %v922_v0 = vpop.f32.mrb[3].mxu0  ;;  %v4503_v28 = vadd.f32 %v3316_v8, %v2818_v26 }
 0x26b   :  { %v4505_v1 = vadd.f32 %v2818_v26, %v922_v0  ;;  %v1515_v0 = vand.u32 4294901760, %v5375_v58 }
 0x2a3   :  { %v3456_v44 = vpop.f32.mrb[0].mxu1 }
 0x2a4   :  { %v4504_v49 = vadd.f32 %v4503_v28, %v3456_v44  ;;  %v1348_v33 = vpop.f32.mrb[1].mxu1  ;;  %v1522_v28 = vand.u32 4294901760, %v5380_v61  ;;  %v1516_v44 = vsub.f32 %v5375_v58, %v1515_v0 }
 0x2a5   :  { %v4506_v42 = vadd.f32 %v4505_v1, %v1348_v33 }
 0x2a6   :  { %v1359_v60 = vmax.f32 %v4504_v49, 0.0  ;;  %v1523_v11 = vsub.f32 %v5380_v61, %v1522_v28  ;;  %v1517_v33 = vand.u32 4294901760, %v1516_v44  ;;  %v1531_v44 = vand.u32 4294901760, %v1530_v31 }
 0x2a7   :  { %v1358_v51 = vmax.f32 %v4506_v42, 0.0  ;;  %v4253_v55 = vpack.c.bf16 %v1522_v28, %v1515_v0 }
 0x2a8   :  { %v5382_v50 = vand.u32 4294901760, %v1359_v60 }
 0x2a9   :  { %v5384_v8 = vand.u32 4294901760, %v1358_v51 }
 0x2aa   :  { %v5388_v26 = vsub.f32 %v1359_v60, %v5382_v50  ;;  %v1524_v60 = vand.u32 4294901760, %v1523_v11 }
 0x2ab   :  { %v5402_v39 = vsub.f32 %v1358_v51, %v5384_v8 }
 0x2ac   :  { %v1476_v45 = vand.u32 4294901760, %v5388_v26 }
 0x2ad   :  { %v1466_v1 = vand.u32 4294901760, %v5402_v39 }
 0x2ae   :  { %v1477_v10 = vsub.f32 %v5388_v26, %v1476_v45 }
 0x2af   :  { %v1467_v51 = vsub.f32 %v5402_v39, %v1466_v1 }
 0x2b0   :  { %v1478_v42 = vand.u32 4294901760, %v1477_v10  ;;  %v1538_v10 = vand.u32 4294901760, %v1537_v30  ;;  %v5442_v30 = vld [vmem:[#allocation10 + $0x10] sm:$0xff] }
 0x2b1   :  { %v1468_v49 = vand.u32 4294901760, %v1467_v51  ;;  %v4157_v51 = vpack.c.bf16 %v1524_v60, %v1517_v33  ;;  %v4189_v33 = vpack.c.bf16 %v5380_v61, %v5375_v58 }
 0x2b2   :  { %v4161_v11 = vpack.c.bf16 %v1538_v10, %v1531_v44  ;;  %v5473_v10 = vld [vmem:[#allocation10 + $0x30] sm:$0xff] }
 0x2b3   :  { %3489 = vmatprep.mubr.f32.mxu0 %v1468_v49  ;;  %v5453_v49 = vld [vmem:[#allocation10 + $0x28] sm:$0xff] }
 0x2b4   :  { %3490 = vmatmul.mubr.f32.vlgmr.msra.gmra.mrb[4].mxu0 %v1478_v42 }
 0x2b5   :  { %4152 = vmatpush3.bf16.msra.mxu0 %v5280_v38  ;;  %3524 = vmatprep.mubr.f32.mxu0 %v5384_v8  ;;  %v5438_v38 = vld [vmem:[#allocation10] sm:$0xff] }
 0x2b6   :  { %4154 = vmatprep.subr.bf16.mxu0 %v5289_v24  ;;  %v5913_v23 = vand.u32 4294901760, %v5438_v38 }
 0x2b9   :  { %4156 = vmatpush3.bf16.msra.mxu0 %v5289_v24  ;;  %v5440_v24 = vld [vmem:[#allocation10 + $0x8] sm:$0xff] }
 0x2ba   :  { %4158 = vmatprep.subr.bf16.mxu0 %v4157_v51  ;;  %v5900_v31 = vand.u32 4294901760, %v5440_v24  ;;  %v5914_v32 = vand.u32 4294901760, %v5440_v24 }
 0x2bd   :  { %4160 = vmatpush3.bf16.msra.mxu0 %v4157_v51  ;;  %v2108_v51 = vand.u32 4294901760, %v5453_v49 }
 0x2be   :  { %4162 = vmatprep.subr.bf16.mxu0 %v4161_v11 }
 0x2c1   :  { %4164 = vmatpush3.bf16.msra.mxu0 %v4161_v11  ;;  %v5475_v11 = vld [vmem:[#allocation10 + $0x38] sm:$0xff] }
 0x2c2   :  { %4166 = vmatprep.subr.bf16.mxu0 %v5309_v13 }
 0x2c5   :  { %4168 = vmatpush3.bf16.msra.mxu0 %v5309_v13  ;;  %v5903_v13 = vand.u32 4294901760, %v5438_v38 }
 0x2c6   :  { %4170 = vmatprep.subr.bf16.mxu0 %v5323_v35 }
 0x2c7   :  { %v5463_v42 = vpack.c.bf16 %v5900_v31, %v5903_v13  ;;  %v4193_v31 = vpack.c.bf16 %v5399_v16, %v5394_v14 }
 0x2c9   :  { %4172 = vmatpush3.bf16.msra.mxu0 %v5323_v35  ;;  %v5448_v35 = vld [vmem:[#allocation10 + $0x18] sm:$0xff]  ;;  %4310 = vmatprep.subr.bf16.mxu1 %v5463_v42 }
 0x2ca   :  { %4174 = vmatprep.subr.bf16.mxu0 %v5343_v59  ;;  %4312 = vmatpush3.bf16.msra.mxu1 %v5463_v42 }
 0x2cd   :  { %4176 = vmatpush3.bf16.msra.mxu0 %v5343_v59  ;;  %v5902_v59 = vand.u32 4294901760, %v5442_v30 }
 0x2ce   :  { %4178 = vmatprep.subr.bf16.mxu0 %v4177_v18 }
 0x2d1   :  { %4180 = vmatpush3.bf16.msra.mxu0 %v4177_v18  ;;  %v5451_v18 = vld [vmem:[#allocation10 + $0x20] sm:$0xff] }
 0x2d2   :  { %4182 = vmatprep.subr.bf16.mxu0 %v5347_v34  ;;  %v2105_v60 = vand.u32 4294901760, %v5451_v18 }
 0x2d4   :  { %3525 = vmatmul.mubr.f32.vlgmr.msra.gmra.mrb[4].mxu0 %v5382_v50 }
 0x2d5   :  { %4184 = vmatpush3.bf16.msra.mxu0 %v5347_v34  ;;  %3559 = vmatprep.mubr.f32.mxu0 %v5402_v39  ;;  %v5901_v34 = vand.u32 4294901760, %v5448_v35 }
 0x2d6   :  { %4186 = vmatprep.subr.bf16.mxu0 %v5351_v36 }
 0x2d7   :  { %v5471_v44 = vpack.c.bf16 %v5901_v34, %v5902_v59  ;;  %v5487_v34 = vpack.c.bf16 %v2108_v51, %v2105_v60  ;;  %v2111_v59 = vand.u32 4294901760, %v5473_v10 }
 0x2d9   :  { %4188 = vmatpush3.bf16.msra.mxu0 %v5351_v36  ;;  %4314 = vmatprep.subr.bf16.mxu1 %v5471_v44  ;;  %v2114_v36 = vand.u32 4294901760, %v5475_v11 }
 0x2da   :  { %4190 = vmatprep.subr.bf16.mxu0 %v4189_v33  ;;  %4316 = vmatpush3.bf16.msra.mxu1 %v5471_v44 }
 0x2db   :  { %4318 = vmatprep.subr.bf16.mxu1 %v5487_v34  ;;  %v5497_v13 = vpack.c.bf16 %v2114_v36, %v2111_v59 }
 0x2dd   :  { %4192 = vmatpush3.bf16.msra.mxu0 %v4189_v33 }
 0x2de   :  { %4194 = vmatprep.subr.bf16.mxu0 %v4193_v31  ;;  %4320 = vmatpush3.bf16.msra.mxu1 %v5487_v34 }
 0x2df   :  { %4322 = vmatprep.subr.bf16.mxu1 %v5497_v13 }
 0x2e1   :  { %4196 = vmatpush3.bf16.msra.mxu0 %v4193_v31 }
 0x2e2   :  { %4198 = vmatprep.subr.bf16.mxu0 %v5355_v41  ;;  %4324 = vmatpush3.bf16.msra.mxu1 %v5497_v13 }
 0x2e5   :  { %4200 = vmatpush3.bf16.msra.mxu0 %v5355_v41  ;;  %v4245_v41 = vpack.c.bf16 %v1494_v48, %v1487_v62  ;;  %v4261_v62 = vpack.c.bf16 %v1550_v63, %v1543_v56  ;;  %v4265_v48 = vpack.c.bf16 %v1564_v12, %v1557_v17  ;;  %v2080_v63 = vld [vmem:[#allocation10 + $0x58] sm:$0xff]  ;;  %v2129_v17 = vand.u32 4294901760, %v2081_v7 }
 0x2e6   :  { %4202 = vmatprep.subr.bf16.mxu0 %v5359_v2  ;;  %v2126_v3 = vand.u32 4294901760, %v2080_v63 }
 0x2e9   :  { %4204 = vmatpush3.bf16.msra.mxu0 %v5359_v2  ;;  %v4249_v2 = vpack.c.bf16 %v1508_v37, %v1501_v53  ;;  %v4269_v53 = vpack.c.bf16 %v5910_v29, %v5909_v6  ;;  %v5911_v37 = vand.u32 4294901760, %v5328_v5  ;;  %v5596_v5 = vsub.f32 %v5438_v38, %v5913_v23 }
 0x2ea   :  { %4206 = vmatprep.subr.bf16.mxu0 %v5363_v15 }
 0x2eb   :  { %v4273_v40 = vpack.c.bf16 %v5912_v25, %v5911_v37 }
 0x2ed   :  { %4208 = vmatpush3.bf16.msra.mxu0 %v5363_v15  ;;  %v2083_v15 = vld [vmem:[#allocation10 + $0x70] sm:$0xff] }
 0x2ee   :  { %4210 = vmatprep.subr.bf16.mxu0 %v5367_v21  ;;  %v2135_v58 = vand.u32 4294901760, %v2083_v15 }
 0x2f1   :  { %4212 = vmatpush3.bf16.msra.mxu0 %v5367_v21  ;;  %v2084_v21 = vld [vmem:[#allocation10 + $0x78] sm:$0xff] }
 0x2f2   :  { %4214 = vmatprep.subr.bf16.mxu0 %v5214_v4  ;;  %v2138_v61 = vand.u32 4294901760, %v2084_v21 }
 0x2f4   :  { %3560 = vmatmul.mubr.f32.vlgmr.msra.gmra.mrb[4].mxu0 %v5388_v26  ;;  %v5607_v26 = vpack.c.bf16 %v2138_v61, %v2135_v58 }
 0x2f5   :  { %4216 = vmatpush3.bf16.msra.mxu0 %v5214_v4  ;;  %3594 = vmatprep.mubr.f32.mxu0 %v1466_v1 }
 0x2f6   :  { %4218 = vmatprep.subr.bf16.mxu0 %v5218_v9 }
 0x2f9   :  { %4220 = vmatpush3.bf16.msra.mxu0 %v5218_v9 }
 0x2fa   :  { %4222 = vmatprep.subr.bf16.mxu0 %v5231_v46 }
 0x2fd   :  { %4224 = vmatpush3.bf16.msra.mxu0 %v5231_v46 }
 0x2fe   :  { %4226 = vmatprep.subr.bf16.mxu0 %v5241_v20 }
 0x301   :  { %4228 = vmatpush3.bf16.msra.mxu0 %v5241_v20 }
 0x302   :  { %4230 = vmatprep.subr.bf16.mxu0 %v5246_v27 }
 0x305   :  { %4232 = vmatpush3.bf16.msra.mxu0 %v5246_v27 }
 0x306   :  { %4234 = vmatprep.subr.bf16.mxu0 %v5250_v43 }
 0x309   :  { %4236 = vmatpush3.bf16.msra.mxu0 %v5250_v43 }
 0x30a   :  { %4238 = vmatprep.subr.bf16.mxu0 %v5254_v52 }
 0x30d   :  { %4240 = vmatpush3.bf16.msra.mxu0 %v5254_v52 }
 0x30e   :  { %4242 = vmatprep.subr.bf16.mxu0 %v5264_v54 }
 0x311   :  { %4244 = vmatpush3.bf16.msra.mxu0 %v5264_v54 }
 0x312   :  { %4246 = vmatprep.subr.bf16.mxu0 %v4245_v41 }
 0x314   :  { %3595 = vmatmul.mubr.f32.vlgmr.msra.gmra.mrb[4].mxu0 %v1476_v45 }
 0x315   :  { %4248 = vmatpush3.bf16.msra.mxu0 %v4245_v41  ;;  %3629 = vmatprep.mubr.f32.mxu0 %v5384_v8  ;;  %v5634_v41 = vsub.f32 %v2080_v63, %v2126_v3  ;;  %v5659_v63 = vsub.f32 %v2084_v21, %v2138_v61 }
 0x316   :  { %4250 = vmatprep.subr.bf16.mxu0 %v4249_v2 }
 0x319   :  { %4252 = vmatpush3.bf16.msra.mxu0 %v4249_v2 }
 0x31a   :  { %4254 = vmatprep.subr.bf16.mxu0 %v4253_v55 }
 0x31d   :  { %4256 = vmatpush3.bf16.msra.mxu0 %v4253_v55 }
 0x31e   :  { %4258 = vmatprep.subr.bf16.mxu0 %v4257_v57 }
 0x321   :  { %4260 = vmatpush3.bf16.msra.mxu0 %v4257_v57 }
 0x322   :  { %4262 = vmatprep.subr.bf16.mxu0 %v4261_v62 }
 0x325   :  { %4264 = vmatpush3.bf16.msra.mxu0 %v4261_v62  ;;  %v5908_v62 = vand.u32 4294901760, %v5634_v41 }
 0x326   :  { %4266 = vmatprep.subr.bf16.mxu0 %v4265_v48 }
 0x327   :  { %v2274_v29 = vsub.f32 %v5634_v41, %v5908_v62 }
 0x329   :  { %4268 = vmatpush3.bf16.msra.mxu0 %v4265_v48 }
 0x32a   :  { %4270 = vmatprep.subr.bf16.mxu0 %v4269_v53 }
 0x32d   :  { %4272 = vmatpush3.bf16.msra.mxu0 %v4269_v53  ;;  %v5646_v53 = vsub.f32 %v2081_v7, %v2129_v17 }
 0x32e   :  { %4274 = vmatprep.subr.bf16.mxu0 %v4273_v40 }
 0x331   :  { %4276 = vmatpush3.bf16.msra.mxu0 %v4273_v40  ;;  %v2275_v40 = vand.u32 4294901760, %v2274_v29 }
 0x332   :  { %4278 = vmatprep.subr.bf16.mxu0 %v5214_v4 }
 0x334   :  { %3630 = vmatmul.mubr.f32.vlgmr.msra.gmra.mrb[4].mxu0 %v5382_v50 }
 0x335   :  { %4280 = vmatpush3.bf16.msra.mxu0 %v5214_v4  ;;  %3664 = vmatprep.mubr.f32.mxu0 %v5384_v8  ;;  %v2077_v4 = vld [vmem:[#allocation10 + $0x40] sm:$0xff]  ;;  %v2196_v8 = vand.u32 4294901760, %v5596_v5 }
 0x336   :  { %4282 = vmatprep.subr.bf16.mxu0 %v5218_v9 }
 0x337   :  { %v2197_v28 = vsub.f32 %v5596_v5, %v2196_v8 }
 0x339   :  { %4284 = vmatpush3.bf16.msra.mxu0 %v5218_v9  ;;  %v2078_v9 = vld [vmem:[#allocation10 + $0x48] sm:$0xff]  ;;  %v2198_v16 = vand.u32 4294901760, %v2197_v28 }
 0x33a   :  { %4286 = vmatprep.subr.bf16.mxu0 %v5231_v46 }
 0x33d   :  { %4288 = vmatpush3.bf16.msra.mxu0 %v5231_v46  ;;  %v2117_v46 = vand.u32 4294901760, %v2077_v4 }
 0x33e   :  { %4290 = vmatprep.subr.bf16.mxu0 %v5241_v20 }
 0x33f   :  { %v5620_v1 = vsub.f32 %v2077_v4, %v2117_v46  ;;  %v5907_v4 = vand.u32 4294901760, %v5646_v53 }
 0x341   :  { %4292 = vmatpush3.bf16.msra.mxu0 %v5241_v20  ;;  %v2120_v20 = vand.u32 4294901760, %v2078_v9  ;;  %v2252_v19 = vand.u32 4294901760, %v5620_v1 }
 0x342   :  { %4294 = vmatprep.subr.bf16.mxu0 %v5246_v27 }
 0x343   :  { %v5583_v56 = vpack.c.bf16 %v2120_v20, %v2117_v46  ;;  %v5622_v47 = vsub.f32 %v2078_v9, %v2120_v20  ;;  %v2281_v20 = vsub.f32 %v5646_v53, %v5907_v4 }
 0x345   :  { %4296 = vmatpush3.bf16.msra.mxu0 %v5246_v27  ;;  %v2079_v27 = vld [vmem:[#allocation10 + $0x50] sm:$0xff]  ;;  %4326 = vmatprep.subr.bf16.mxu1 %v5583_v56  ;;  %v2259_v38 = vand.u32 4294901760, %v5622_v47  ;;  %v5682_v28 = vpack.c.bf16 %v5622_v47, %v5620_v1 }
 0x346   :  { %4298 = vmatprep.subr.bf16.mxu0 %v5250_v43  ;;  %4328 = vmatpush3.bf16.msra.mxu1 %v5583_v56 }
 0x347   :  { %v2260_v31 = vsub.f32 %v5622_v47, %v2259_v38  ;;  %v5921_v47 = vand.u32 4294901760, %v5659_v63 }
 0x349   :  { %4300 = vmatpush3.bf16.msra.mxu0 %v5250_v43  ;;  %v2123_v43 = vand.u32 4294901760, %v2079_v27  ;;  %v2261_v55 = vand.u32 4294901760, %v2260_v31  ;;  %v5915_v31 = vand.u32 4294901760, %v5442_v30 }
 0x34a   :  { %4302 = vmatprep.subr.bf16.mxu0 %v5254_v52 }
 0x34b   :  { %v5632_v33 = vsub.f32 %v2079_v27, %v2123_v43  ;;  %v5657_v27 = vsub.f32 %v2083_v15, %v2135_v58 }
 0x34d   :  { %4304 = vmatpush3.bf16.msra.mxu0 %v5254_v52  ;;  %v5587_v52 = vpack.c.bf16 %v2126_v3, %v2123_v43  ;;  %v2266_v57 = vand.u32 4294901760, %v5632_v33  ;;  %v2282_v3 = vand.u32 4294901760, %v2281_v20  ;;  %v5905_v7 = vand.u32 4294901760, %v5657_v27 }
 0x34e   :  { %4306 = vmatprep.subr.bf16.mxu0 %v5264_v54 }
 0x34f   :  { %4330 = vmatprep.subr.bf16.mxu1 %v5587_v52  ;;  %v2267_v6 = vsub.f32 %v5632_v33, %v2266_v57 }
 0x350   :  { %4332 = vmatpush3.bf16.msra.mxu1 %v5587_v52 }
 0x351   :  { %4308 = vmatpush3.bf16.msra.mxu0 %v5264_v54  ;;  %v2082_v54 = vld [vmem:[#allocation10 + $0x68] sm:$0xff]  ;;  %v2268_v25 = vand.u32 4294901760, %v2267_v6 }
 0x352   :  { %v2132_v12 = vand.u32 4294901760, %v2082_v54 }
 0x353   :  { %v5652_v46 = vpack.c.bf16 %v2275_v40, %v2268_v25 }
 0x354   :  { %3665 = vmatmul.mubr.f32.vlgmr.msra.gmra.mrb[4].mxu0 %v5382_v50  ;;  %v5591_v22 = vpack.c.bf16 %v2132_v12, %v2129_v17  ;;  %v5601_v50 = vsub.f32 %v5440_v24, %v5914_v32  ;;  %v2253_v24 = vsub.f32 %v5620_v1, %v2252_v19  ;;  %v5648_v37 = vsub.f32 %v2082_v54, %v2132_v12 }
 0x355   :  { %v5904_v54 = vand.u32 4294901760, %v5659_v63  ;;  %v2295_v12 = vsub.f32 %v5657_v27, %v5905_v7  ;;  %v5920_v1 = vand.u32 4294901760, %v5657_v27 }
 0x356   :  { %4334 = vmatprep.subr.bf16.mxu1 %v5591_v22  ;;  %v2203_v0 = vand.u32 4294901760, %v5601_v50  ;;  %v2254_v2 = vand.u32 4294901760, %v2253_v24  ;;  %v5906_v9 = vand.u32 4294901760, %v5648_v37  ;;  %v5678_v61 = vpack.c.bf16 %v5601_v50, %v5596_v5  ;;  %v2819_v24 = vld [vmem:[%s5892_s6] ss:$0 sm:$0xff] }
 0x357   :  { %4336 = vmatpush3.bf16.msra.mxu1 %v5591_v22  ;;  %v2302_v23 = vsub.f32 %v5659_v63, %v5904_v54  ;;  %v2296_v15 = vand.u32 4294901760, %v2295_v12  ;;  %v5719_v12 = vsub.f32 %v5453_v49, %v2108_v51  ;;  %v5739_v51 = vsub.f32 %v5473_v10, %v2111_v59 }
 0x358   :  { %v2204_v14 = vsub.f32 %v5601_v50, %v2203_v0  ;;  %4338 = vmatprep.subr.bf16.mxu1 %v5607_v26  ;;  %v5638_v48 = vpack.c.bf16 %v2261_v55, %v2254_v2  ;;  %v2288_v43 = vsub.f32 %v5648_v37, %v5906_v9  ;;  %v5702_v2 = vsub.f32 %v5442_v30, %v5915_v31 }
 0x359   :  { %v2303_v21 = vand.u32 4294901760, %v2302_v23  ;;  %v5916_v55 = vand.u32 4294901760, %v5448_v35  ;;  %v2231_v49 = vand.u32 4294901760, %v5719_v12  ;;  %v5744_v31 = vsub.f32 %v5475_v11, %v2114_v36 }
 0x35a   :  { %v2205_v39 = vand.u32 4294901760, %v2204_v14  ;;  %v2289_v17 = vand.u32 4294901760, %v2288_v43  ;;  %v5686_v14 = vpack.c.bf16 %v5634_v41, %v5632_v33  ;;  %v2210_v43 = vand.u32 4294901760, %v5702_v2 }
 0x35b   :  { %4340 = vmatpush3.bf16.msra.mxu1 %v5607_v26  ;;  %v5674_v58 = vpack.c.bf16 %v2303_v21, %v2296_v15  ;;  %v5707_v6 = vsub.f32 %v5448_v35, %v5916_v55  ;;  %v2232_v10 = vsub.f32 %v5719_v12, %v2231_v49  ;;  %v2238_v11 = vand.u32 4294901760, %v5739_v51 }
 0x35c   :  { %v5617_v45 = vpack.c.bf16 %v2205_v39, %v2198_v16  ;;  %v5672_v32 = vpack.c.bf16 %v2289_v17, %v2282_v3  ;;  %v5690_v16 = vpack.c.bf16 %v5648_v37, %v5646_v53  ;;  %v5694_v39 = vpack.c.bf16 %v5659_v63, %v5657_v27 }
 0x35d   :  { %v2217_v3 = vand.u32 4294901760, %v5707_v6  ;;  %v5714_v17 = vsub.f32 %v5451_v18, %v2105_v60  ;;  %v2211_v21 = vsub.f32 %v5702_v2, %v2210_v43  ;;  %v2245_v36 = vand.u32 4294901760, %v5744_v31 }
 0x35e   :  { %4342 = vmatprep.subr.bf16.mxu1 %v5617_v45  ;;  %v2233_v9 = vand.u32 4294901760, %v2232_v10  ;;  %v2239_v4 = vsub.f32 %v5739_v51, %v2238_v11 }
 0x35f   :  { %v2218_v18 = vsub.f32 %v5707_v6, %v2217_v3  ;;  %v2224_v60 = vand.u32 4294901760, %v5714_v17  ;;  %v2246_v62 = vsub.f32 %v5744_v31, %v2245_v36  ;;  %v4449_v50 = vpack.c.bf16 %v2245_v36, %v2238_v11 }
 0x361   :  { %v4445_v5 = vpack.c.bf16 %v2231_v49, %v2224_v60 }
 0x427   :  { %v3666_v29 = vpop.f32.mrb[4].mxu0 }
 0x428   :  { %v4507_v25 = vadd.f32 %v3666_v29, %v2819_v24  ;;  %v2057_v40 = vpop.f32.mrb[5].mxu0 }
 0x429   :  { %v4508_v20 = vadd.f32 %v2819_v24, %v2057_v40  ;;  %v2212_v40 = vand.u32 4294901760, %v2211_v21 }
 0x42a   :  { %v2068_v30 = vmax.f32 %v4507_v25, 0.0 }
 0x42b   :  { %v2067_v35 = vmax.f32 %v4508_v20, 0.0  ;;  %v2219_v20 = vand.u32 4294901760, %v2218_v18 }
 0x42c   :  { %v5721_v23 = vand.u32 4294901760, %v2068_v30 }
 0x42d   :  { %v5723_v15 = vand.u32 4294901760, %v2067_v35  ;;  %v4345_v18 = vpack.c.bf16 %v2219_v20, %v2212_v40  ;;  %v2240_v40 = vand.u32 4294901760, %v2239_v4  ;;  %v2247_v20 = vand.u32 4294901760, %v2246_v62 }
 0x42e   :  { %v5733_v24 = vsub.f32 %v2068_v30, %v5721_v23  ;;  %v2225_v30 = vsub.f32 %v5714_v17, %v2224_v60  ;;  %v4381_v62 = vpack.c.bf16 %v5719_v12, %v5714_v17  ;;  %v4437_v4 = vpack.c.bf16 %v2203_v0, %v2196_v8 }
 0x42f   :  { %v5747_v55 = vsub.f32 %v2067_v35, %v5723_v15  ;;  %v4453_v8 = vpack.c.bf16 %v2259_v38, %v2252_v19  ;;  %v5917_v0 = vand.u32 4294901760, %v5634_v41  ;;  %v4465_v19 = vpack.c.bf16 %v5921_v47, %v5920_v1 }
 0x430   :  { %v2185_v29 = vand.u32 4294901760, %v5733_v24  ;;  %v2226_v54 = vand.u32 4294901760, %v2225_v30  ;;  %v4353_v30 = vpack.c.bf16 %v2247_v20, %v2240_v40 }
 0x431   :  { %v2175_v25 = vand.u32 4294901760, %v5747_v55 }
 0x432   :  { %v2186_v59 = vsub.f32 %v5733_v24, %v2185_v29 }
 0x433   :  { %v2176_v35 = vsub.f32 %v5747_v55, %v2175_v25 }
 0x434   :  { %v2187_v7 = vand.u32 4294901760, %v2186_v59 }
 0x435   :  { %v2177_v21 = vand.u32 4294901760, %v2176_v35  ;;  %v4349_v35 = vpack.c.bf16 %v2233_v9, %v2226_v54  ;;  %v4441_v9 = vpack.c.bf16 %v2217_v3, %v2210_v43  ;;  %v5919_v54 = vand.u32 4294901760, %v5648_v37 }
 0x437   :  { %3699 = vmatprep.mubr.f32.mxu1 %v2177_v21 }
 0x438   :  { %3700 = vmatmul.mubr.f32.vlgmr.msra.gmra.mrb[2].mxu1 %v2187_v7  ;;  %v5918_v7 = vand.u32 4294901760, %v5646_v53 }
 0x439   :  { %4344 = vmatpush3.bf16.msra.mxu1 %v5617_v45  ;;  %3734 = vmatprep.mubr.f32.mxu1 %v5723_v15  ;;  %v4377_v45 = vpack.c.bf16 %v5707_v6, %v5702_v2 }
 0x43a   :  { %4346 = vmatprep.subr.bf16.mxu1 %v4345_v18 }
 0x43d   :  { %4348 = vmatpush3.bf16.msra.mxu1 %v4345_v18 }
 0x43e   :  { %4350 = vmatprep.subr.bf16.mxu1 %v4349_v35 }
 0x441   :  { %4352 = vmatpush3.bf16.msra.mxu1 %v4349_v35 }
 0x442   :  { %4354 = vmatprep.subr.bf16.mxu1 %v4353_v30 }
 0x445   :  { %4356 = vmatpush3.bf16.msra.mxu1 %v4353_v30 }
 0x446   :  { %4358 = vmatprep.subr.bf16.mxu1 %v5638_v48 }
 0x449   :  { %4360 = vmatpush3.bf16.msra.mxu1 %v5638_v48  ;;  %v4385_v48 = vpack.c.bf16 %v5744_v31, %v5739_v51 }
 0x44a   :  { %4362 = vmatprep.subr.bf16.mxu1 %v5652_v46 }
 0x44d   :  { %4364 = vmatpush3.bf16.msra.mxu1 %v5652_v46  ;;  %v4457_v46 = vpack.c.bf16 %v5917_v0, %v2266_v57 }
 0x44e   :  { %4366 = vmatprep.subr.bf16.mxu1 %v5672_v32 }
 0x451   :  { %4368 = vmatpush3.bf16.msra.mxu1 %v5672_v32  ;;  %v4461_v32 = vpack.c.bf16 %v5919_v54, %v5918_v7 }
 0x452   :  { %4370 = vmatprep.subr.bf16.mxu1 %v5674_v58 }
 0x455   :  { %4372 = vmatpush3.bf16.msra.mxu1 %v5674_v58 }
 0x456   :  { %4374 = vmatprep.subr.bf16.mxu1 %v5678_v61 }
 0x458   :  { %3735 = vmatmul.mubr.f32.vlgmr.msra.gmra.mrb[2].mxu1 %v5721_v23 }
 0x459   :  { %4376 = vmatpush3.bf16.msra.mxu1 %v5678_v61  ;;  %3769 = vmatprep.mubr.f32.mxu1 %v5747_v55 }
 0x45a   :  { %4378 = vmatprep.subr.bf16.mxu1 %v4377_v45 }
 0x45d   :  { %4380 = vmatpush3.bf16.msra.mxu1 %v4377_v45 }
 0x45e   :  { %4382 = vmatprep.subr.bf16.mxu1 %v4381_v62 }
 0x461   :  { %4384 = vmatpush3.bf16.msra.mxu1 %v4381_v62 }
 0x462   :  { %4386 = vmatprep.subr.bf16.mxu1 %v4385_v48 }
 0x465   :  { %4388 = vmatpush3.bf16.msra.mxu1 %v4385_v48 }
 0x466   :  { %4390 = vmatprep.subr.bf16.mxu1 %v5682_v28 }
 0x469   :  { %4392 = vmatpush3.bf16.msra.mxu1 %v5682_v28 }
 0x46a   :  { %4394 = vmatprep.subr.bf16.mxu1 %v5686_v14 }
 0x46d   :  { %4396 = vmatpush3.bf16.msra.mxu1 %v5686_v14 }
 0x46e   :  { %4398 = vmatprep.subr.bf16.mxu1 %v5690_v16 }
 0x471   :  { %4400 = vmatpush3.bf16.msra.mxu1 %v5690_v16 }
 0x472   :  { %4402 = vmatprep.subr.bf16.mxu1 %v5694_v39 }
 0x475   :  { %4404 = vmatpush3.bf16.msra.mxu1 %v5694_v39 }
 0x476   :  { %4406 = vmatprep.subr.bf16.mxu1 %v5463_v42 }
 0x478   :  { %3770 = vmatmul.mubr.f32.vlgmr.msra.gmra.mrb[2].mxu1 %v5733_v24 }
 0x479   :  { %4408 = vmatpush3.bf16.msra.mxu1 %v5463_v42  ;;  %3804 = vmatprep.mubr.f32.mxu1 %v2175_v25 }
 0x47a   :  { %4410 = vmatprep.subr.bf16.mxu1 %v5471_v44 }
 0x47d   :  { %4412 = vmatpush3.bf16.msra.mxu1 %v5471_v44 }
 0x47e   :  { %4414 = vmatprep.subr.bf16.mxu1 %v5487_v34 }
 0x481   :  { %4416 = vmatpush3.bf16.msra.mxu1 %v5487_v34 }
 0x482   :  { %4418 = vmatprep.subr.bf16.mxu1 %v5497_v13 }
 0x485   :  { %4420 = vmatpush3.bf16.msra.mxu1 %v5497_v13 }
 0x486   :  { %4422 = vmatprep.subr.bf16.mxu1 %v5583_v56 }
 0x489   :  { %4424 = vmatpush3.bf16.msra.mxu1 %v5583_v56 }
 0x48a   :  { %4426 = vmatprep.subr.bf16.mxu1 %v5587_v52 }
 0x48d   :  { %4428 = vmatpush3.bf16.msra.mxu1 %v5587_v52 }
 0x48e   :  { %4430 = vmatprep.subr.bf16.mxu1 %v5591_v22 }
 0x491   :  { %4432 = vmatpush3.bf16.msra.mxu1 %v5591_v22 }
 0x492   :  { %4434 = vmatprep.subr.bf16.mxu1 %v5607_v26 }
 0x495   :  { %4436 = vmatpush3.bf16.msra.mxu1 %v5607_v26 }
 0x496   :  { %4438 = vmatprep.subr.bf16.mxu1 %v4437_v4 }
 0x498   :  { %3805 = vmatmul.mubr.f32.vlgmr.msra.gmra.mrb[2].mxu1 %v2185_v29 }
 0x499   :  { %4440 = vmatpush3.bf16.msra.mxu1 %v4437_v4  ;;  %3839 = vmatprep.mubr.f32.mxu1 %v5723_v15 }
 0x49a   :  { %4442 = vmatprep.subr.bf16.mxu1 %v4441_v9 }
 0x49d   :  { %4444 = vmatpush3.bf16.msra.mxu1 %v4441_v9 }
 0x49e   :  { %4446 = vmatprep.subr.bf16.mxu1 %v4445_v5 }
 0x4a1   :  { %4448 = vmatpush3.bf16.msra.mxu1 %v4445_v5 }
 0x4a2   :  { %4450 = vmatprep.subr.bf16.mxu1 %v4449_v50 }
 0x4a5   :  { %4452 = vmatpush3.bf16.msra.mxu1 %v4449_v50 }
 0x4a6   :  { %4454 = vmatprep.subr.bf16.mxu1 %v4453_v8 }
 0x4a9   :  { %4456 = vmatpush3.bf16.msra.mxu1 %v4453_v8 }
 0x4aa   :  { %4458 = vmatprep.subr.bf16.mxu1 %v4457_v46 }
 0x4ad   :  { %4460 = vmatpush3.bf16.msra.mxu1 %v4457_v46 }
 0x4ae   :  { %4462 = vmatprep.subr.bf16.mxu1 %v4461_v32 }
 0x4b1   :  { %4464 = vmatpush3.bf16.msra.mxu1 %v4461_v32 }
 0x4b2   :  { %4466 = vmatprep.subr.bf16.mxu1 %v4465_v19 }
 0x4b5   :  { %4468 = vmatpush3.bf16.msra.mxu1 %v4465_v19 }
 0x4b6   :  { %4470 = vmatprep.subr.bf16.mxu1 %v5463_v42 }
 0x4b8   :  { %3840 = vmatmul.mubr.f32.vlgmr.msra.gmra.mrb[2].mxu1 %v5721_v23 }
 0x4b9   :  { %4472 = vmatpush3.bf16.msra.mxu1 %v5463_v42  ;;  %3874 = vmatprep.mubr.f32.mxu1 %v5723_v15 }
 0x4ba   :  { %4474 = vmatprep.subr.bf16.mxu1 %v5471_v44 }
 0x4bd   :  { %4476 = vmatpush3.bf16.msra.mxu1 %v5471_v44 }
 0x4be   :  { %4478 = vmatprep.subr.bf16.mxu1 %v5487_v34 }
 0x4c1   :  { %4480 = vmatpush3.bf16.msra.mxu1 %v5487_v34 }
 0x4c2   :  { %4482 = vmatprep.subr.bf16.mxu1 %v5497_v13 }
 0x4c5   :  { %4484 = vmatpush3.bf16.msra.mxu1 %v5497_v13  ;;  %v2820_v13 = vld [vmem:[%s5894_s8] ss:$0 sm:$0xff] }
 0x4c6   :  { %4486 = vmatprep.subr.bf16.mxu1 %v5583_v56 }
 0x4c9   :  { %4488 = vmatpush3.bf16.msra.mxu1 %v5583_v56 }
 0x4ca   :  { %4490 = vmatprep.subr.bf16.mxu1 %v5587_v52 }
 0x4cd   :  { %4492 = vmatpush3.bf16.msra.mxu1 %v5587_v52 }
 0x4ce   :  { %4494 = vmatprep.subr.bf16.mxu1 %v5591_v22 }
 0x4d1   :  { %4496 = vmatpush3.bf16.msra.mxu1 %v5591_v22 }
 0x4d2   :  { %4498 = vmatprep.subr.bf16.mxu1 %v5607_v26 }
 0x4d5   :  { %4500 = vmatpush3.bf16.msra.mxu1 %v5607_v26 }
 0x4d8   :  { %3875 = vmatmul.mubr.f32.vlgmr.msra.gmra.mrb[2].mxu1 %v5721_v23 }
 0x5ab   :  { %v3876_v34 = vpop.f32.mrb[2].mxu1 }
 0x5ac   :  { %v2766_v42 = vpop.f32.mrb[3].mxu1  ;;  %v4509_v56 = vadd.f32 %v3876_v34, %v2820_v13 }
 0x5ad   :  { %v4510_v44 = vadd.f32 %v2820_v13, %v2766_v42 }
 0x5af   :  { %2776 = vmax.xlane.f32.xlu0 %v4510_v44 }
 0x5b3   :  { %2778 = vmax.xlane.f32.xlu0 %v4509_v56 }
 0x63c   :  { %v2777_v52 = vpop.xlane.xlu0 %2776 }
 0x63d   :  { %v2780_v38 = vsub.f32 %v4510_v44, %v2777_v52 }
 0x63f   :  { %v2782_v33 = vmul.f32 1.442695, %v2780_v38 }
 0x640   :  { %v2779_v22 = vpop.xlane.xlu0 %2778 }
 0x641   :  { %v2781_v41 = vsub.f32 %v4509_v56, %v2779_v22  ;;  %4557 = vpow2.f32 %v2782_v33 }
 0x643   :  { %v2784_v57 = vmul.f32 1.442695, %v2781_v41 }
 0x645   :  { %4559 = vpow2.f32 %v2784_v57 }
 0x64b   :  { %v4558_v26 = vpop.eup %4557 }
 0x64c   :  { %2786 = vadd.xlane.f32.xlu1 %v4558_v26 }
 0x64f   :  { %v4560_v53 = vpop.eup %4559 }
 0x650   :  { %2788 = vadd.xlane.f32.xlu1 %v4560_v53 }
 0x6d9   :  { %v2787_v37 = vpop.xlane.xlu1 %2786 }
 0x6da   :  { %4561 = vlog2.f32 %v2787_v37 }
 0x6dd   :  { %v2789_v27 = vpop.xlane.xlu1 %2788 }
 0x6de   :  { %4563 = vlog2.f32 %v2789_v27 }
 0x6e4   :  { %v4562_v63 = vpop.eup %4561 }
 0x6e5   :  { %v2791_v58 = vmul.f32 0.6931472, %v4562_v63 }
 0x6e7   :  { %v2794_v61 = vsub.f32 %v2780_v38, %v2791_v58 }
 0x6e8   :  { %v4564_v28 = vpop.eup %4563 }
 0x6e9   :  { %2796 = vst [vmem:[#allocation11] sm:$0xff] %v2794_v61  ;;  %v2793_v14 = vmul.f32 0.6931472, %v4564_v28 }
 0x6eb   :  { %v2795_v16 = vsub.f32 %v2781_v41, %v2793_v14 }
 0x6ed   :  { %2797 = vst [vmem:[#allocation11 + $0x8] sm:$0xff] %v2795_v16 }
 0x6ee   :  { %2802 = vsyncadd [#allocation4], 128  ;;  %s4712_s8 = smov [#allocation11]  }
 0x6ef   :  { %s2803_s13 = sshll.u32 %s4712_s8, 4  ;;  %s2804_s13 = int_to_ptr.vmem [resolvable:$true] %s2803_s13 }
 0x6f0   :  { %s4675_s1 = scalar_lea.vmem %s2804_s13, 128  ;;  %s4679_s10 = scalar_lea.vmem %s2804_s13, 256 }
 0x6f1   :  { %p4676_p12 = scmp.ne.s32.totalorder %s2804_s13, %s4675_s1  ;;  %p4680_p13 = scmp.lt.s32.totalorder %s2804_s13, %s2804_s13 }
 0x6f2   :  { %p4681_p0 = scmp.lt.s32.totalorder %s4679_s10, %s4675_s1 }
 0x6f4   :  { %p4682_p1 = por %p4681_p0, %p4680_p13 }
 0x6f6   :  { %p4683_p2 = pnand %p4682_p1, %p4676_p12 }
 0x6f8   :  { %4686 = shalt.err (!%p4683_p2)
}
 0x6f9   :  { %s4687_s0 = scalar_lea.hbm %s5895_s9, 128 }
 0x6fa   :  { %p4688_p3 = scmp.ne.s32.totalorder %s5895_s9, %s4687_s0  ;;  %p4691_p4 = scmp.lt.u32.totalorder %s4687_s0, %s5895_s9 }
 0x6fc   :  { %p4693_p5 = pnand %p4691_p4, %p4688_p3 }
 0x6fe   :  { %4696 = shalt.err (!%p4693_p5)
}
 0x6ff   :  { %2809 = dma.vmem_to_hbm [thread:$0]  %s2804_s13, 128, %s5895_s9, [#allocation4], %s4707_s21, %s4707_s21, %s4708_s22  }
 0x700   :  { %4703 = dma.done.wait [#allocation4], 256  }
 0x701   :  { %4704 = vsyncadd [#allocation4], 4294967040 }
 0x702   :  { %2813 = vsyncpa [#allocation3], 1 }
 0x703   :  { %2814 = vsyncpa [#allocation6], 1 }
 0x704   :  { %2815 = vsyncpa [#allocation9], 1 }
 0x705   :  { %2816 = vsyncpa [#allocation4], 1 }

</bundles_post_ra>
